<compile_context>
chip_gen: v5e
topology: v5e:2x2
jax: 0.10.0
libtpu: 0.0.40
codegen_flags: <defaults>
</compile_context>

<pallas_src>
import functools

import jax
import jax.numpy as jnp
from jax import lax
from jax.experimental import pallas as pl
from jax.experimental.pallas import tpu as pltpu


# ---------------------------------------------------------------------------
# Host-side helpers
# ---------------------------------------------------------------------------

def _tap_masks_host(H, W, nb):
    """(9, 1, nb*H*W) f32 validity mask per 3x3 tap (emulates zero padding).

    The mask is periodic per image, so it is tiled nb times along the lane
    axis; any roll wrap (row wrap, cross-image, or whole-slab wrap) lands
    exactly on positions the mask zeroes.
    """
    HW = H * W
    pos = jnp.arange(HW, dtype=jnp.int32)
    hh = pos // W
    ww = pos % W
    rows = []
    for dh in (-1, 0, 1):
        for dw in (-1, 0, 1):
            valid = ((hh + dh >= 0) & (hh + dh < H) &
                     (ww + dw >= 0) & (ww + dw < W))
            rows.append(valid.astype(jnp.float32))
    m = jnp.stack(rows, axis=0)                    # (9, HW)
    m = jnp.tile(m, (1, nb))                       # (9, nb*HW), per-image periodic
    return m.reshape(9, 1, nb * HW)


def _choose_images_per_block(N, C, HW):
    """Largest nb that divides N, fits comfortably in VMEM, and (when the
    batch allows) keeps the grid >= 2 steps for v7x megacore sharding."""
    per_img_bytes = (6 * C + 9) * HW * 4           # x, y1, acc, temps, out, masks
    cap = max(1, (8 << 20) // per_img_bytes)       # stay well under scoped VMEM
    nb = min(N, cap)
    if nb == N and N >= 4 and N % 2 == 0:
        nb = N // 2                                # >= 2 parallel steps for v7x
    while N % nb != 0:
        nb -= 1
    return nb


# ---------------------------------------------------------------------------
# Kernel
# ---------------------------------------------------------------------------

def _conv3x3_taps(inp, m_ref, w_ref, W, L, mm_dtype):
    """3x3 'same' conv on a lane-dense slab via 9 per-tap dots.

    inp   : (Cin, L) f32 slab (L = nb*H*W, images concatenated on lanes)
    m_ref : (9, 1, L) tap validity masks
    w_ref : (9, Cout, Cin) per-tap weights (BN scale pre-folded)
    Returns (Cout, L) f32 accumulator.
    """
    acc = None
    t = 0
    for dh in (-1, 0, 1):
        for dw in (-1, 0, 1):
            off = dh * W + dw
            if off == 0:
                tap = inp
            else:
                # XLU lane rotation + boundary mask: no padded copies, and any
                # cross-image / wrap leakage is zeroed by the mask.
                tap = pltpu.roll(inp, shift=(-off) % L, axis=1) * m_ref[t]
            w_t = w_ref[t].astype(mm_dtype)
            c = jnp.dot(w_t, tap.astype(mm_dtype),
                        preferred_element_type=jnp.float32)
            acc = c if acc is None else acc + c
            t += 1
    return acc


def _residual_block_kernel(x_ref, m_ref, w1_ref, b1_ref, w2_ref, b2_ref,
                           out_ref, *, W, mm_dtype):
    """Fused relu(conv2(relu(conv1(x)+b1)) + b2 + x); BN scales pre-folded.

    x_ref  : (C, L)      lane-dense input slab (L = nb*H*W)
    m_ref  : (9, 1, L)   tap masks
    w1_ref : (9, C, C)   conv1 per-tap weights
    b1_ref : (C, 1)
    w2_ref : (9, C, C)
    b2_ref : (C, 1)
    out_ref: (C, L)
    """
    x = x_ref[...]
    L = x.shape[1]

    # conv1 + folded BN1 + ReLU -- intermediate never leaves VMEM.
    y1 = jnp.maximum(_conv3x3_taps(x, m_ref, w1_ref, W, L, mm_dtype)
                     + b1_ref[...], 0.0)
    # conv2 + folded BN2 + residual + ReLU (epilogue stays f32).
    y2 = _conv3x3_taps(y1, m_ref, w2_ref, W, L, mm_dtype) + b2_ref[...]
    out_ref[...] = jnp.maximum(y2 + x, 0.0).astype(out_ref.dtype)


# ---------------------------------------------------------------------------
# pallas_call wrapper
# ---------------------------------------------------------------------------

def residual_block_pallas(x_nchw, w1_taps, b1, w2_taps, b2,
                          *, images_per_block=None, matmul_in_bf16=False):
    N, C, H, W = x_nchw.shape
    HW = H * W
    Cout = w1_taps.shape[1]
    assert C == Cout, "residual add requires in_channels == out_channels"

    nb = images_per_block or _choose_images_per_block(N, C, HW)
    assert N % nb == 0, "images_per_block must divide the batch"
    L = nb * HW

    # Lane-dense slab: (C, N*HW), images concatenated along the lane axis.
    x_slab = jnp.transpose(x_nchw, (1, 0, 2, 3)).reshape(C, N * HW)
    masks = _tap_masks_host(H, W, nb)                       # (9, 1, L)

    mm_dtype = jnp.bfloat16 if matmul_in_bf16 else jnp.float32
    flops = 2 * 2 * 9 * Cout * C * HW * N                   # two 3x3 convs
    bytes_accessed = 4 * (2 * N * Cout * HW + 9 * L
                          + 9 * Cout * (C + Cout) + 2 * Cout)

    out_slab = pl.pallas_call(
        functools.partial(_residual_block_kernel, W=W, mm_dtype=mm_dtype),
        out_shape=jax.ShapeDtypeStruct((Cout, N * HW), jnp.float32),
        grid=(N // nb,),
        in_specs=[
            pl.BlockSpec((C, L), lambda n: (0, n)),
            pl.BlockSpec((9, 1, L), lambda n: (0, 0, 0)),
            pl.BlockSpec((9, Cout, C), lambda n: (0, 0, 0)),
            pl.BlockSpec((Cout, 1), lambda n: (0, 0)),
            pl.BlockSpec((9, Cout, Cout), lambda n: (0, 0, 0)),
            pl.BlockSpec((Cout, 1), lambda n: (0, 0)),
        ],
        out_specs=pl.BlockSpec((Cout, L), lambda n: (0, n)),
        compiler_params=pltpu.CompilerParams(
            dimension_semantics=("parallel",)),
        cost_estimate=pl.CostEstimate(
            flops=flops, transcendentals=0, bytes_accessed=bytes_accessed),
    )(x_slab, masks, w1_taps, b1.reshape(Cout, 1), w2_taps, b2.reshape(Cout, 1))

    # Layout plumbing back to NCHW (wrapper-side; cheap XLA transpose).
    return out_slab.reshape(Cout, N, H, W).transpose(1, 0, 2, 3)


@functools.partial(jax.jit, static_argnames=("use_batchnorm", "matmul_in_bf16"))
def residual_block_forward(x_nchw, params, use_batchnorm=True,
                           matmul_in_bf16=False):
    """ResidualBlock.forward (in==out channels, stride=1, no downsample)."""
    eps = 1e-5
    w1 = params["w1"].astype(jnp.float32)      # (Cout, Cin, 3, 3) OIHW
    w2 = params["w2"].astype(jnp.float32)
    Cout, Cin = w1.shape[0], w1.shape[1]

    if use_batchnorm:
        s1 = params["gamma1"] * lax.rsqrt(params["var1"] + eps)
        b1 = params["beta1"] - params["mean1"] * s1
        s2 = params["gamma2"] * lax.rsqrt(params["var2"] + eps)
        b2 = params["beta2"] - params["mean2"] * s2
    else:
        s1 = jnp.ones((Cout,), jnp.float32)
        b1 = jnp.zeros((Cout,), jnp.float32)
        s2, b2 = s1, b1

    # Fold BN scale into the conv weights (tiny one-time op).
    w1s = w1 * s1[:, None, None, None]
    w2s = w2 * s2[:, None, None, None]
    # OIHW -> (kh, kw, O, I) -> (9, O, I): tap order matches the kernel loop.
    w1_taps = jnp.transpose(w1s, (2, 3, 0, 1)).reshape(9, Cout, Cin)
    w2_taps = jnp.transpose(w2s, (2, 3, 0, 1)).reshape(9, Cout, Cout)

    return residual_block_pallas(x_nchw, w1_taps, b1, w2_taps, b2,
                                 matmul_in_bf16=matmul_in_bf16)


# ---------------------------------------------------------------------------
# Pure-JAX reference (matches the PyTorch module, eval-mode BN)
# ---------------------------------------------------------------------------

def _reference_forward(x_nchw, params, use_batchnorm=True):
    eps = 1e-5

    def conv(x, w):
        return lax.conv_general_dilated(
            x, w, window_strides=(1, 1), padding="SAME",
            dimension_numbers=("NCHW", "OIHW", "NCHW"))

    def bn(x, g, b, m, v):
        g = g[None, :, None, None]
        b = b[None, :, None, None]
        m = m[None, :, None, None]
        v = v[None, :, None, None]
        return (x - m) * lax.rsqrt(v + eps) * g + b

    residual = x_nchw
    out = conv(x_nchw, params["w1"])
    if use_batchnorm:
        out = bn(out, params["gamma1"], params["beta1"],
                 params["mean1"], params["var1"])
    out = jnp.maximum(out, 0.0)
    out = conv(out, params["w2"])
    if use_batchnorm:
        out = bn(out, params["gamma2"], params["beta2"],
                 params["mean2"], params["var2"])
    out = out + residual
    return jnp.maximum(out, 0.0)


if __name__ == "__main__":
    N, C, H, W = 2, 4, 16, 16  # in_channels == out_channels, stride=1, no downsample

    key = jax.random.PRNGKey(0)
    ks = jax.random.split(key, 10)

    fan_in = C * 3 * 3
    params = {
        "w1": jax.random.normal(ks[0], (C, C, 3, 3), jnp.float32) / jnp.sqrt(fan_in),
        "w2": jax.random.normal(ks[1], (C, C, 3, 3), jnp.float32) / jnp.sqrt(fan_in),
        "gamma1": 1.0 + 0.1 * jax.random.normal(ks[2], (C,), jnp.float32),
        "beta1": 0.1 * jax.random.normal(ks[3], (C,), jnp.float32),
        "mean1": 0.1 * jax.random.normal(ks[4], (C,), jnp.float32),
        "var1": 0.5 + jnp.abs(jax.random.normal(ks[5], (C,), jnp.float32)),
        "gamma2": 1.0 + 0.1 * jax.random.normal(ks[6], (C,), jnp.float32),
        "beta2": 0.1 * jax.random.normal(ks[7], (C,), jnp.float32),
        "mean2": 0.1 * jax.random.normal(ks[8], (C,), jnp.float32),
        "var2": 0.5 + jnp.abs(jax.random.normal(ks[0], (C,), jnp.float32)),
    }

    x = jax.random.normal(ks[9], (N, C, H, W), jnp.float32)

    # f32 path, BN on (eval-mode folded BN).
    out = jax.block_until_ready(residual_block_forward(x, params, use_batchnorm=True))
    ref = _reference_forward(x, params, use_batchnorm=True)
    assert out.shape == (N, C, H, W)
    assert jnp.allclose(out, ref, atol=1e-4, rtol=1e-4), (
        float(jnp.max(jnp.abs(out - ref))))

    # f32 path, BN off branch of the module.
    out_nb = jax.block_until_ready(
        residual_block_forward(x, params, use_batchnorm=False))
    ref_nb = _reference_forward(x, params, use_batchnorm=False)
    assert jnp.allclose(out_nb, ref_nb, atol=1e-4, rtol=1e-4), (
        float(jnp.max(jnp.abs(out_nb - ref_nb))))

    # bf16 MXU-operand path (v6e/v7x); epilogue stays f32, loose tolerance.
    out_bf = jax.block_until_ready(
        residual_block_forward(x, params, use_batchnorm=True, matmul_in_bf16=True))
    assert jnp.allclose(out_bf, ref, atol=1e-1, rtol=1e-1), (
        float(jnp.max(jnp.abs(out_bf - ref))))

    print("KERNEL_OK")
</pallas_src>

<mosaic_0001>
module attributes {stable_mosaic.version = 11 : i64} {
  func.func @_residual_block_kernel(%arg0: i32, %arg1: memref<4x512xf32, #tpu.memory_space<vmem>>, %arg2: memref<9x1x512xf32, #tpu.memory_space<vmem>>, %arg3: memref<9x4x4xf32, #tpu.memory_space<vmem>>, %arg4: memref<4x1xf32, #tpu.memory_space<vmem>>, %arg5: memref<9x4x4xf32, #tpu.memory_space<vmem>>, %arg6: memref<4x1xf32, #tpu.memory_space<vmem>>, %arg7: memref<4x512xf32, #tpu.memory_space<vmem>>) attributes {dimension_semantics = [#tpu.dimension_semantics<parallel>], iteration_bounds = array<i64: 1>, scalar_prefetch = 0 : i64, scratch_operands = 0 : i64, tpu.core_type = #tpu.core_type<tc>, window_params = [{transform_indices = @transform_0, window_bounds = array<i64: 4, 512>}, {pipeline_mode = #tpu.pipeline_mode<synchronous>, transform_indices = @transform_1, window_bounds = array<i64: 9, 1, 512>}, {pipeline_mode = #tpu.pipeline_mode<synchronous>, transform_indices = @transform_2, window_bounds = array<i64: 9, 4, 4>}, {pipeline_mode = #tpu.pipeline_mode<synchronous>, transform_indices = @transform_3, window_bounds = array<i64: 4, 1>}, {pipeline_mode = #tpu.pipeline_mode<synchronous>, transform_indices = @transform_4, window_bounds = array<i64: 9, 4, 4>}, {pipeline_mode = #tpu.pipeline_mode<synchronous>, transform_indices = @transform_5, window_bounds = array<i64: 4, 1>}, {transform_indices = @transform_6, window_bounds = array<i64: 4, 512>}]} {
    %c0 = arith.constant 0 : index
    %c0_0 = arith.constant 0 : index
    %0 = vector.load %arg1[%c0, %c0_0] : memref<4x512xf32, #tpu.memory_space<vmem>>, vector<4x512xf32>
    %c17_i32 = arith.constant 17 : i32
    %1 = tpu.dynamic_rotate %0 by %c17_i32 dim 1 : vector<4x512xf32>, i32 -> vector<4x512xf32>
    %c0_1 = arith.constant 0 : index
    %c0_2 = arith.constant 0 : index
    %c0_3 = arith.constant 0 : index
    %2 = vector.load %arg2[%c0_1, %c0_2, %c0_3] : memref<9x1x512xf32, #tpu.memory_space<vmem>>, vector<1x1x512xf32>
    %3 = vector.shape_cast %2 : vector<1x1x512xf32> to vector<1x512xf32>
    %4 = vector.broadcast %3 : vector<1x512xf32> to vector<4x512xf32>
    %5 = arith.mulf %1, %4 : vector<4x512xf32>
    %c0_4 = arith.constant 0 : index
    %c0_5 = arith.constant 0 : index
    %c0_6 = arith.constant 0 : index
    %6 = vector.load %arg3[%c0_4, %c0_5, %c0_6] : memref<9x4x4xf32, #tpu.memory_space<vmem>>, vector<1x4x4xf32>
    %7 = vector.shape_cast %6 : vector<1x4x4xf32> to vector<4x4xf32>
    %cst = arith.constant dense<0.000000e+00> : vector<4x512xf32>
    %8 = tpu.matmul %7, %5, %cst {dimension_numbers = #tpu.dot_dimension_numbers<[1], [0], [0], [1], [0, 0, 1, 1], [], []>} : vector<4x4xf32>, vector<4x512xf32>, vector<4x512xf32> -> vector<4x512xf32>
    %c16_i32 = arith.constant 16 : i32
    %9 = tpu.dynamic_rotate %0 by %c16_i32 dim 1 : vector<4x512xf32>, i32 -> vector<4x512xf32>
    %c1 = arith.constant 1 : index
    %c0_7 = arith.constant 0 : index
    %c0_8 = arith.constant 0 : index
    %10 = vector.load %arg2[%c1, %c0_7, %c0_8] : memref<9x1x512xf32, #tpu.memory_space<vmem>>, vector<1x1x512xf32>
    %11 = vector.shape_cast %10 : vector<1x1x512xf32> to vector<1x512xf32>
    %12 = vector.broadcast %11 : vector<1x512xf32> to vector<4x512xf32>
    %13 = arith.mulf %9, %12 : vector<4x512xf32>
    %c1_9 = arith.constant 1 : index
    %c0_10 = arith.constant 0 : index
    %c0_11 = arith.constant 0 : index
    %14 = vector.load %arg3[%c1_9, %c0_10, %c0_11] : memref<9x4x4xf32, #tpu.memory_space<vmem>>, vector<1x4x4xf32>
    %15 = vector.shape_cast %14 : vector<1x4x4xf32> to vector<4x4xf32>
    %cst_12 = arith.constant dense<0.000000e+00> : vector<4x512xf32>
    %16 = tpu.matmul %15, %13, %cst_12 {dimension_numbers = #tpu.dot_dimension_numbers<[1], [0], [0], [1], [0, 0, 1, 1], [], []>} : vector<4x4xf32>, vector<4x512xf32>, vector<4x512xf32> -> vector<4x512xf32>
    %17 = arith.addf %8, %16 : vector<4x512xf32>
    %c15_i32 = arith.constant 15 : i32
    %18 = tpu.dynamic_rotate %0 by %c15_i32 dim 1 : vector<4x512xf32>, i32 -> vector<4x512xf32>
    %c2 = arith.constant 2 : index
    %c0_13 = arith.constant 0 : index
    %c0_14 = arith.constant 0 : index
    %19 = vector.load %arg2[%c2, %c0_13, %c0_14] : memref<9x1x512xf32, #tpu.memory_space<vmem>>, vector<1x1x512xf32>
    %20 = vector.shape_cast %19 : vector<1x1x512xf32> to vector<1x512xf32>
    %21 = vector.broadcast %20 : vector<1x512xf32> to vector<4x512xf32>
    %22 = arith.mulf %18, %21 : vector<4x512xf32>
    %c2_15 = arith.constant 2 : index
    %c0_16 = arith.constant 0 : index
    %c0_17 = arith.constant 0 : index
    %23 = vector.load %arg3[%c2_15, %c0_16, %c0_17] : memref<9x4x4xf32, #tpu.memory_space<vmem>>, vector<1x4x4xf32>
    %24 = vector.shape_cast %23 : vector<1x4x4xf32> to vector<4x4xf32>
    %cst_18 = arith.constant dense<0.000000e+00> : vector<4x512xf32>
    %25 = tpu.matmul %24, %22, %cst_18 {dimension_numbers = #tpu.dot_dimension_numbers<[1], [0], [0], [1], [0, 0, 1, 1], [], []>} : vector<4x4xf32>, vector<4x512xf32>, vector<4x512xf32> -> vector<4x512xf32>
    %26 = arith.addf %17, %25 : vector<4x512xf32>
    %c1_i32 = arith.constant 1 : i32
    %27 = tpu.dynamic_rotate %0 by %c1_i32 dim 1 : vector<4x512xf32>, i32 -> vector<4x512xf32>
    %c3 = arith.constant 3 : index
    %c0_19 = arith.constant 0 : index
    %c0_20 = arith.constant 0 : index
    %28 = vector.load %arg2[%c3, %c0_19, %c0_20] : memref<9x1x512xf32, #tpu.memory_space<vmem>>, vector<1x1x512xf32>
    %29 = vector.shape_cast %28 : vector<1x1x512xf32> to vector<1x512xf32>
    %30 = vector.broadcast %29 : vector<1x512xf32> to vector<4x512xf32>
    %31 = arith.mulf %27, %30 : vector<4x512xf32>
    %c3_21 = arith.constant 3 : index
    %c0_22 = arith.constant 0 : index
    %c0_23 = arith.constant 0 : index
    %32 = vector.load %arg3[%c3_21, %c0_22, %c0_23] : memref<9x4x4xf32, #tpu.memory_space<vmem>>, vector<1x4x4xf32>
    %33 = vector.shape_cast %32 : vector<1x4x4xf32> to vector<4x4xf32>
    %cst_24 = arith.constant dense<0.000000e+00> : vector<4x512xf32>
    %34 = tpu.matmul %33, %31, %cst_24 {dimension_numbers = #tpu.dot_dimension_numbers<[1], [0], [0], [1], [0, 0, 1, 1], [], []>} : vector<4x4xf32>, vector<4x512xf32>, vector<4x512xf32> -> vector<4x512xf32>
    %35 = arith.addf %26, %34 : vector<4x512xf32>
    %c4 = arith.constant 4 : index
    %c0_25 = arith.constant 0 : index
    %c0_26 = arith.constant 0 : index
    %36 = vector.load %arg3[%c4, %c0_25, %c0_26] : memref<9x4x4xf32, #tpu.memory_space<vmem>>, vector<1x4x4xf32>
    %37 = vector.shape_cast %36 : vector<1x4x4xf32> to vector<4x4xf32>
    %cst_27 = arith.constant dense<0.000000e+00> : vector<4x512xf32>
    %38 = tpu.matmul %37, %0, %cst_27 {dimension_numbers = #tpu.dot_dimension_numbers<[1], [0], [0], [1], [0, 0, 1, 1], [], []>} : vector<4x4xf32>, vector<4x512xf32>, vector<4x512xf32> -> vector<4x512xf32>
    %39 = arith.addf %35, %38 : vector<4x512xf32>
    %c511_i32 = arith.constant 511 : i32
    %40 = tpu.dynamic_rotate %0 by %c511_i32 dim 1 : vector<4x512xf32>, i32 -> vector<4x512xf32>
    %c5 = arith.constant 5 : index
    %c0_28 = arith.constant 0 : index
    %c0_29 = arith.constant 0 : index
    %41 = vector.load %arg2[%c5, %c0_28, %c0_29] : memref<9x1x512xf32, #tpu.memory_space<vmem>>, vector<1x1x512xf32>
    %42 = vector.shape_cast %41 : vector<1x1x512xf32> to vector<1x512xf32>
    %43 = vector.broadcast %42 : vector<1x512xf32> to vector<4x512xf32>
    %44 = arith.mulf %40, %43 : vector<4x512xf32>
    %c5_30 = arith.constant 5 : index
    %c0_31 = arith.constant 0 : index
    %c0_32 = arith.constant 0 : index
    %45 = vector.load %arg3[%c5_30, %c0_31, %c0_32] : memref<9x4x4xf32, #tpu.memory_space<vmem>>, vector<1x4x4xf32>
    %46 = vector.shape_cast %45 : vector<1x4x4xf32> to vector<4x4xf32>
    %cst_33 = arith.constant dense<0.000000e+00> : vector<4x512xf32>
    %47 = tpu.matmul %46, %44, %cst_33 {dimension_numbers = #tpu.dot_dimension_numbers<[1], [0], [0], [1], [0, 0, 1, 1], [], []>} : vector<4x4xf32>, vector<4x512xf32>, vector<4x512xf32> -> vector<4x512xf32>
    %48 = arith.addf %39, %47 : vector<4x512xf32>
    %c497_i32 = arith.constant 497 : i32
    %49 = tpu.dynamic_rotate %0 by %c497_i32 dim 1 : vector<4x512xf32>, i32 -> vector<4x512xf32>
    %c6 = arith.constant 6 : index
    %c0_34 = arith.constant 0 : index
    %c0_35 = arith.constant 0 : index
    %50 = vector.load %arg2[%c6, %c0_34, %c0_35] : memref<9x1x512xf32, #tpu.memory_space<vmem>>, vector<1x1x512xf32>
    %51 = vector.shape_cast %50 : vector<1x1x512xf32> to vector<1x512xf32>
    %52 = vector.broadcast %51 : vector<1x512xf32> to vector<4x512xf32>
    %53 = arith.mulf %49, %52 : vector<4x512xf32>
    %c6_36 = arith.constant 6 : index
    %c0_37 = arith.constant 0 : index
    %c0_38 = arith.constant 0 : index
    %54 = vector.load %arg3[%c6_36, %c0_37, %c0_38] : memref<9x4x4xf32, #tpu.memory_space<vmem>>, vector<1x4x4xf32>
    %55 = vector.shape_cast %54 : vector<1x4x4xf32> to vector<4x4xf32>
    %cst_39 = arith.constant dense<0.000000e+00> : vector<4x512xf32>
    %56 = tpu.matmul %55, %53, %cst_39 {dimension_numbers = #tpu.dot_dimension_numbers<[1], [0], [0], [1], [0, 0, 1, 1], [], []>} : vector<4x4xf32>, vector<4x512xf32>, vector<4x512xf32> -> vector<4x512xf32>
    %57 = arith.addf %48, %56 : vector<4x512xf32>
    %c496_i32 = arith.constant 496 : i32
    %58 = tpu.dynamic_rotate %0 by %c496_i32 dim 1 : vector<4x512xf32>, i32 -> vector<4x512xf32>
    %c7 = arith.constant 7 : index
    %c0_40 = arith.constant 0 : index
    %c0_41 = arith.constant 0 : index
    %59 = vector.load %arg2[%c7, %c0_40, %c0_41] : memref<9x1x512xf32, #tpu.memory_space<vmem>>, vector<1x1x512xf32>
    %60 = vector.shape_cast %59 : vector<1x1x512xf32> to vector<1x512xf32>
    %61 = vector.broadcast %60 : vector<1x512xf32> to vector<4x512xf32>
    %62 = arith.mulf %58, %61 : vector<4x512xf32>
    %c7_42 = arith.constant 7 : index
    %c0_43 = arith.constant 0 : index
    %c0_44 = arith.constant 0 : index
    %63 = vector.load %arg3[%c7_42, %c0_43, %c0_44] : memref<9x4x4xf32, #tpu.memory_space<vmem>>, vector<1x4x4xf32>
    %64 = vector.shape_cast %63 : vector<1x4x4xf32> to vector<4x4xf32>
    %cst_45 = arith.constant dense<0.000000e+00> : vector<4x512xf32>
    %65 = tpu.matmul %64, %62, %cst_45 {dimension_numbers = #tpu.dot_dimension_numbers<[1], [0], [0], [1], [0, 0, 1, 1], [], []>} : vector<4x4xf32>, vector<4x512xf32>, vector<4x512xf32> -> vector<4x512xf32>
    %66 = arith.addf %57, %65 : vector<4x512xf32>
    %c495_i32 = arith.constant 495 : i32
    %67 = tpu.dynamic_rotate %0 by %c495_i32 dim 1 : vector<4x512xf32>, i32 -> vector<4x512xf32>
    %c8 = arith.constant 8 : index
    %c0_46 = arith.constant 0 : index
    %c0_47 = arith.constant 0 : index
    %68 = vector.load %arg2[%c8, %c0_46, %c0_47] : memref<9x1x512xf32, #tpu.memory_space<vmem>>, vector<1x1x512xf32>
    %69 = vector.shape_cast %68 : vector<1x1x512xf32> to vector<1x512xf32>
    %70 = vector.broadcast %69 : vector<1x512xf32> to vector<4x512xf32>
    %71 = arith.mulf %67, %70 : vector<4x512xf32>
    %c8_48 = arith.constant 8 : index
    %c0_49 = arith.constant 0 : index
    %c0_50 = arith.constant 0 : index
    %72 = vector.load %arg3[%c8_48, %c0_49, %c0_50] : memref<9x4x4xf32, #tpu.memory_space<vmem>>, vector<1x4x4xf32>
    %73 = vector.shape_cast %72 : vector<1x4x4xf32> to vector<4x4xf32>
    %cst_51 = arith.constant dense<0.000000e+00> : vector<4x512xf32>
    %74 = tpu.matmul %73, %71, %cst_51 {dimension_numbers = #tpu.dot_dimension_numbers<[1], [0], [0], [1], [0, 0, 1, 1], [], []>} : vector<4x4xf32>, vector<4x512xf32>, vector<4x512xf32> -> vector<4x512xf32>
    %75 = arith.addf %66, %74 : vector<4x512xf32>
    %c0_52 = arith.constant 0 : index
    %c0_53 = arith.constant 0 : index
    %76 = vector.load %arg4[%c0_52, %c0_53] : memref<4x1xf32, #tpu.memory_space<vmem>>, vector<4x1xf32>
    %77 = vector.broadcast %76 : vector<4x1xf32> to vector<4x512xf32>
    %78 = arith.addf %75, %77 : vector<4x512xf32>
    %cst_54 = arith.constant 0.000000e+00 : f32
    %79 = vector.broadcast %cst_54 : f32 to vector<4x512xf32>
    %80 = arith.maximumf %78, %79 : vector<4x512xf32>
    %c17_i32_55 = arith.constant 17 : i32
    %81 = tpu.dynamic_rotate %80 by %c17_i32_55 dim 1 : vector<4x512xf32>, i32 -> vector<4x512xf32>
    %c0_56 = arith.constant 0 : index
    %c0_57 = arith.constant 0 : index
    %c0_58 = arith.constant 0 : index
    %82 = vector.load %arg2[%c0_56, %c0_57, %c0_58] : memref<9x1x512xf32, #tpu.memory_space<vmem>>, vector<1x1x512xf32>
    %83 = vector.shape_cast %82 : vector<1x1x512xf32> to vector<1x512xf32>
    %84 = vector.broadcast %83 : vector<1x512xf32> to vector<4x512xf32>
    %85 = arith.mulf %81, %84 : vector<4x512xf32>
    %c0_59 = arith.constant 0 : index
    %c0_60 = arith.constant 0 : index
    %c0_61 = arith.constant 0 : index
    %86 = vector.load %arg5[%c0_59, %c0_60, %c0_61] : memref<9x4x4xf32, #tpu.memory_space<vmem>>, vector<1x4x4xf32>
    %87 = vector.shape_cast %86 : vector<1x4x4xf32> to vector<4x4xf32>
    %cst_62 = arith.constant dense<0.000000e+00> : vector<4x512xf32>
    %88 = tpu.matmul %87, %85, %cst_62 {dimension_numbers = #tpu.dot_dimension_numbers<[1], [0], [0], [1], [0, 0, 1, 1], [], []>} : vector<4x4xf32>, vector<4x512xf32>, vector<4x512xf32> -> vector<4x512xf32>
    %c16_i32_63 = arith.constant 16 : i32
    %89 = tpu.dynamic_rotate %80 by %c16_i32_63 dim 1 : vector<4x512xf32>, i32 -> vector<4x512xf32>
    %c1_64 = arith.constant 1 : index
    %c0_65 = arith.constant 0 : index
    %c0_66 = arith.constant 0 : index
    %90 = vector.load %arg2[%c1_64, %c0_65, %c0_66] : memref<9x1x512xf32, #tpu.memory_space<vmem>>, vector<1x1x512xf32>
    %91 = vector.shape_cast %90 : vector<1x1x512xf32> to vector<1x512xf32>
    %92 = vector.broadcast %91 : vector<1x512xf32> to vector<4x512xf32>
    %93 = arith.mulf %89, %92 : vector<4x512xf32>
    %c1_67 = arith.constant 1 : index
    %c0_68 = arith.constant 0 : index
    %c0_69 = arith.constant 0 : index
    %94 = vector.load %arg5[%c1_67, %c0_68, %c0_69] : memref<9x4x4xf32, #tpu.memory_space<vmem>>, vector<1x4x4xf32>
    %95 = vector.shape_cast %94 : vector<1x4x4xf32> to vector<4x4xf32>
    %cst_70 = arith.constant dense<0.000000e+00> : vector<4x512xf32>
    %96 = tpu.matmul %95, %93, %cst_70 {dimension_numbers = #tpu.dot_dimension_numbers<[1], [0], [0], [1], [0, 0, 1, 1], [], []>} : vector<4x4xf32>, vector<4x512xf32>, vector<4x512xf32> -> vector<4x512xf32>
    %97 = arith.addf %88, %96 : vector<4x512xf32>
    %c15_i32_71 = arith.constant 15 : i32
    %98 = tpu.dynamic_rotate %80 by %c15_i32_71 dim 1 : vector<4x512xf32>, i32 -> vector<4x512xf32>
    %c2_72 = arith.constant 2 : index
    %c0_73 = arith.constant 0 : index
    %c0_74 = arith.constant 0 : index
    %99 = vector.load %arg2[%c2_72, %c0_73, %c0_74] : memref<9x1x512xf32, #tpu.memory_space<vmem>>, vector<1x1x512xf32>
    %100 = vector.shape_cast %99 : vector<1x1x512xf32> to vector<1x512xf32>
    %101 = vector.broadcast %100 : vector<1x512xf32> to vector<4x512xf32>
    %102 = arith.mulf %98, %101 : vector<4x512xf32>
    %c2_75 = arith.constant 2 : index
    %c0_76 = arith.constant 0 : index
    %c0_77 = arith.constant 0 : index
    %103 = vector.load %arg5[%c2_75, %c0_76, %c0_77] : memref<9x4x4xf32, #tpu.memory_space<vmem>>, vector<1x4x4xf32>
    %104 = vector.shape_cast %103 : vector<1x4x4xf32> to vector<4x4xf32>
    %cst_78 = arith.constant dense<0.000000e+00> : vector<4x512xf32>
    %105 = tpu.matmul %104, %102, %cst_78 {dimension_numbers = #tpu.dot_dimension_numbers<[1], [0], [0], [1], [0, 0, 1, 1], [], []>} : vector<4x4xf32>, vector<4x512xf32>, vector<4x512xf32> -> vector<4x512xf32>
    %106 = arith.addf %97, %105 : vector<4x512xf32>
    %c1_i32_79 = arith.constant 1 : i32
    %107 = tpu.dynamic_rotate %80 by %c1_i32_79 dim 1 : vector<4x512xf32>, i32 -> vector<4x512xf32>
    %c3_80 = arith.constant 3 : index
    %c0_81 = arith.constant 0 : index
    %c0_82 = arith.constant 0 : index
    %108 = vector.load %arg2[%c3_80, %c0_81, %c0_82] : memref<9x1x512xf32, #tpu.memory_space<vmem>>, vector<1x1x512xf32>
    %109 = vector.shape_cast %108 : vector<1x1x512xf32> to vector<1x512xf32>
    %110 = vector.broadcast %109 : vector<1x512xf32> to vector<4x512xf32>
    %111 = arith.mulf %107, %110 : vector<4x512xf32>
    %c3_83 = arith.constant 3 : index
    %c0_84 = arith.constant 0 : index
    %c0_85 = arith.constant 0 : index
    %112 = vector.load %arg5[%c3_83, %c0_84, %c0_85] : memref<9x4x4xf32, #tpu.memory_space<vmem>>, vector<1x4x4xf32>
    %113 = vector.shape_cast %112 : vector<1x4x4xf32> to vector<4x4xf32>
    %cst_86 = arith.constant dense<0.000000e+00> : vector<4x512xf32>
    %114 = tpu.matmul %113, %111, %cst_86 {dimension_numbers = #tpu.dot_dimension_numbers<[1], [0], [0], [1], [0, 0, 1, 1], [], []>} : vector<4x4xf32>, vector<4x512xf32>, vector<4x512xf32> -> vector<4x512xf32>
    %115 = arith.addf %106, %114 : vector<4x512xf32>
    %c4_87 = arith.constant 4 : index
    %c0_88 = arith.constant 0 : index
    %c0_89 = arith.constant 0 : index
    %116 = vector.load %arg5[%c4_87, %c0_88, %c0_89] : memref<9x4x4xf32, #tpu.memory_space<vmem>>, vector<1x4x4xf32>
    %117 = vector.shape_cast %116 : vector<1x4x4xf32> to vector<4x4xf32>
    %cst_90 = arith.constant dense<0.000000e+00> : vector<4x512xf32>
    %118 = tpu.matmul %117, %80, %cst_90 {dimension_numbers = #tpu.dot_dimension_numbers<[1], [0], [0], [1], [0, 0, 1, 1], [], []>} : vector<4x4xf32>, vector<4x512xf32>, vector<4x512xf32> -> vector<4x512xf32>
    %119 = arith.addf %115, %118 : vector<4x512xf32>
    %c511_i32_91 = arith.constant 511 : i32
    %120 = tpu.dynamic_rotate %80 by %c511_i32_91 dim 1 : vector<4x512xf32>, i32 -> vector<4x512xf32>
    %c5_92 = arith.constant 5 : index
    %c0_93 = arith.constant 0 : index
    %c0_94 = arith.constant 0 : index
    %121 = vector.load %arg2[%c5_92, %c0_93, %c0_94] : memref<9x1x512xf32, #tpu.memory_space<vmem>>, vector<1x1x512xf32>
    %122 = vector.shape_cast %121 : vector<1x1x512xf32> to vector<1x512xf32>
    %123 = vector.broadcast %122 : vector<1x512xf32> to vector<4x512xf32>
    %124 = arith.mulf %120, %123 : vector<4x512xf32>
    %c5_95 = arith.constant 5 : index
    %c0_96 = arith.constant 0 : index
    %c0_97 = arith.constant 0 : index
    %125 = vector.load %arg5[%c5_95, %c0_96, %c0_97] : memref<9x4x4xf32, #tpu.memory_space<vmem>>, vector<1x4x4xf32>
    %126 = vector.shape_cast %125 : vector<1x4x4xf32> to vector<4x4xf32>
    %cst_98 = arith.constant dense<0.000000e+00> : vector<4x512xf32>
    %127 = tpu.matmul %126, %124, %cst_98 {dimension_numbers = #tpu.dot_dimension_numbers<[1], [0], [0], [1], [0, 0, 1, 1], [], []>} : vector<4x4xf32>, vector<4x512xf32>, vector<4x512xf32> -> vector<4x512xf32>
    %128 = arith.addf %119, %127 : vector<4x512xf32>
    %c497_i32_99 = arith.constant 497 : i32
    %129 = tpu.dynamic_rotate %80 by %c497_i32_99 dim 1 : vector<4x512xf32>, i32 -> vector<4x512xf32>
    %c6_100 = arith.constant 6 : index
    %c0_101 = arith.constant 0 : index
    %c0_102 = arith.constant 0 : index
    %130 = vector.load %arg2[%c6_100, %c0_101, %c0_102] : memref<9x1x512xf32, #tpu.memory_space<vmem>>, vector<1x1x512xf32>
    %131 = vector.shape_cast %130 : vector<1x1x512xf32> to vector<1x512xf32>
    %132 = vector.broadcast %131 : vector<1x512xf32> to vector<4x512xf32>
    %133 = arith.mulf %129, %132 : vector<4x512xf32>
    %c6_103 = arith.constant 6 : index
    %c0_104 = arith.constant 0 : index
    %c0_105 = arith.constant 0 : index
    %134 = vector.load %arg5[%c6_103, %c0_104, %c0_105] : memref<9x4x4xf32, #tpu.memory_space<vmem>>, vector<1x4x4xf32>
    %135 = vector.shape_cast %134 : vector<1x4x4xf32> to vector<4x4xf32>
    %cst_106 = arith.constant dense<0.000000e+00> : vector<4x512xf32>
    %136 = tpu.matmul %135, %133, %cst_106 {dimension_numbers = #tpu.dot_dimension_numbers<[1], [0], [0], [1], [0, 0, 1, 1], [], []>} : vector<4x4xf32>, vector<4x512xf32>, vector<4x512xf32> -> vector<4x512xf32>
    %137 = arith.addf %128, %136 : vector<4x512xf32>
    %c496_i32_107 = arith.constant 496 : i32
    %138 = tpu.dynamic_rotate %80 by %c496_i32_107 dim 1 : vector<4x512xf32>, i32 -> vector<4x512xf32>
    %c7_108 = arith.constant 7 : index
    %c0_109 = arith.constant 0 : index
    %c0_110 = arith.constant 0 : index
    %139 = vector.load %arg2[%c7_108, %c0_109, %c0_110] : memref<9x1x512xf32, #tpu.memory_space<vmem>>, vector<1x1x512xf32>
    %140 = vector.shape_cast %139 : vector<1x1x512xf32> to vector<1x512xf32>
    %141 = vector.broadcast %140 : vector<1x512xf32> to vector<4x512xf32>
    %142 = arith.mulf %138, %141 : vector<4x512xf32>
    %c7_111 = arith.constant 7 : index
    %c0_112 = arith.constant 0 : index
    %c0_113 = arith.constant 0 : index
    %143 = vector.load %arg5[%c7_111, %c0_112, %c0_113] : memref<9x4x4xf32, #tpu.memory_space<vmem>>, vector<1x4x4xf32>
    %144 = vector.shape_cast %143 : vector<1x4x4xf32> to vector<4x4xf32>
    %cst_114 = arith.constant dense<0.000000e+00> : vector<4x512xf32>
    %145 = tpu.matmul %144, %142, %cst_114 {dimension_numbers = #tpu.dot_dimension_numbers<[1], [0], [0], [1], [0, 0, 1, 1], [], []>} : vector<4x4xf32>, vector<4x512xf32>, vector<4x512xf32> -> vector<4x512xf32>
    %146 = arith.addf %137, %145 : vector<4x512xf32>
    %c495_i32_115 = arith.constant 495 : i32
    %147 = tpu.dynamic_rotate %80 by %c495_i32_115 dim 1 : vector<4x512xf32>, i32 -> vector<4x512xf32>
    %c8_116 = arith.constant 8 : index
    %c0_117 = arith.constant 0 : index
    %c0_118 = arith.constant 0 : index
    %148 = vector.load %arg2[%c8_116, %c0_117, %c0_118] : memref<9x1x512xf32, #tpu.memory_space<vmem>>, vector<1x1x512xf32>
    %149 = vector.shape_cast %148 : vector<1x1x512xf32> to vector<1x512xf32>
    %150 = vector.broadcast %149 : vector<1x512xf32> to vector<4x512xf32>
    %151 = arith.mulf %147, %150 : vector<4x512xf32>
    %c8_119 = arith.constant 8 : index
    %c0_120 = arith.constant 0 : index
    %c0_121 = arith.constant 0 : index
    %152 = vector.load %arg5[%c8_119, %c0_120, %c0_121] : memref<9x4x4xf32, #tpu.memory_space<vmem>>, vector<1x4x4xf32>
    %153 = vector.shape_cast %152 : vector<1x4x4xf32> to vector<4x4xf32>
    %cst_122 = arith.constant dense<0.000000e+00> : vector<4x512xf32>
    %154 = tpu.matmul %153, %151, %cst_122 {dimension_numbers = #tpu.dot_dimension_numbers<[1], [0], [0], [1], [0, 0, 1, 1], [], []>} : vector<4x4xf32>, vector<4x512xf32>, vector<4x512xf32> -> vector<4x512xf32>
    %155 = arith.addf %146, %154 : vector<4x512xf32>
    %c0_123 = arith.constant 0 : index
    %c0_124 = arith.constant 0 : index
    %156 = vector.load %arg6[%c0_123, %c0_124] : memref<4x1xf32, #tpu.memory_space<vmem>>, vector<4x1xf32>
    %157 = vector.broadcast %156 : vector<4x1xf32> to vector<4x512xf32>
    %158 = arith.addf %155, %157 : vector<4x512xf32>
    %159 = arith.addf %158, %0 : vector<4x512xf32>
    %cst_125 = arith.constant 0.000000e+00 : f32
    %160 = vector.broadcast %cst_125 : f32 to vector<4x512xf32>
    %161 = arith.maximumf %159, %160 : vector<4x512xf32>
    %c0_126 = arith.constant 0 : index
    %c0_127 = arith.constant 0 : index
    %162 = vector.load %arg7[%c0_126, %c0_127] : memref<4x512xf32, #tpu.memory_space<vmem>>, vector<4x512xf32>
    tpu.vector_store %arg7[%c0_126, %c0_127], %161 {strides = array<i32>} : memref<4x512xf32, #tpu.memory_space<vmem>>, vector<4x512xf32>,
    return
  }
  func.func @transform_0(%arg0: i32) -> (i32, i32) {
    %c0_i32 = arith.constant 0 : i32
    %c0_i32_0 = arith.constant 0 : i32
    return %c0_i32, %arg0 : i32, i32
  }
  func.func @transform_1(%arg0: i32) -> (i32, i32, i32) {
    %c0_i32 = arith.constant 0 : i32
    %c0_i32_0 = arith.constant 0 : i32
    %c0_i32_1 = arith.constant 0 : i32
    %c0_i32_2 = arith.constant 0 : i32
    return %c0_i32, %c0_i32_0, %c0_i32_1 : i32, i32, i32
  }
  func.func @transform_2(%arg0: i32) -> (i32, i32, i32) {
    %c0_i32 = arith.constant 0 : i32
    %c0_i32_0 = arith.constant 0 : i32
    %c0_i32_1 = arith.constant 0 : i32
    %c0_i32_2 = arith.constant 0 : i32
    return %c0_i32, %c0_i32_0, %c0_i32_1 : i32, i32, i32
  }
  func.func @transform_3(%arg0: i32) -> (i32, i32) {
    %c0_i32 = arith.constant 0 : i32
    %c0_i32_0 = arith.constant 0 : i32
    %c0_i32_1 = arith.constant 0 : i32
    return %c0_i32, %c0_i32_0 : i32, i32
  }
  func.func @transform_4(%arg0: i32) -> (i32, i32, i32) {
    %c0_i32 = arith.constant 0 : i32
    %c0_i32_0 = arith.constant 0 : i32
    %c0_i32_1 = arith.constant 0 : i32
    %c0_i32_2 = arith.constant 0 : i32
    return %c0_i32, %c0_i32_0, %c0_i32_1 : i32, i32, i32
  }
  func.func @transform_5(%arg0: i32) -> (i32, i32) {
    %c0_i32 = arith.constant 0 : i32
    %c0_i32_0 = arith.constant 0 : i32
    %c0_i32_1 = arith.constant 0 : i32
    return %c0_i32, %c0_i32_0 : i32, i32
  }
  func.func @transform_6(%arg0: i32) -> (i32, i32) {
    %c0_i32 = arith.constant 0 : i32
    %c0_i32_0 = arith.constant 0 : i32
    return %c0_i32, %arg0 : i32, i32
  }
}

</mosaic_0001>

<bundles_post_ra>
// kernel: residual_block_forward.1
= control target key start
LH: loop header
LB: loop body
LE: loop exit
PB: predicated region body
PF: predicated region fallthrough
CT: control target
= control target key end

     0   :  { %s2510_s25 = smov 17   ;;  %s2512_s26 = smov 15   ;;  %v46_v42 = vlaneseq  ;;  %vm113_vm2 = vcmask 1043456   ;;  %vm109_vm3 = vcmask 31744   ;;  %s3270_s0 = inlined_call_operand.vmem [shape: f32[4,512], index: 0, kind: input, shape index: {}]   ;;  %s3271_s1 = inlined_call_operand.vmem [shape: f32[9,1,512], index: 1, kind: input, shape index: {}]   ;;  %s3272_s2 = inlined_call_operand.vmem [shape: f32[9,4,4], index: 2, kind: input, shape index: {}]   ;;  %s3273_s3 = inlined_call_operand.vmem [shape: f32[4,1], index: 3, kind: input, shape index: {}]   ;;  %s3274_s5 = inlined_call_operand.vmem [shape: f32[4,1], index: 5, kind: input, shape index: {}]   ;;  %s3275_s4 = inlined_call_operand.vmem [shape: f32[9,4,4], index: 4, kind: input, shape index: {}]   ;;  %s3276_s6 = inlined_call_operand.vmem [shape: f32[4,512], index: 6, kind: output, shape index: {}]  }
   0x1   :  { %v2557_v0 = vld [vmem:[%s3270_s0] sm:$0xff]  ;;  %v2562_v1 = vld [vmem:[%s3270_s0 + $0x8] sm:$0xff]  ;;  %s2511_s0 = smov 16   ;;  %s2513_s27 = smov 1  }
   0x2   :  { %27 = vst [vmem:[#allocation1] ss:$2 sm:$0xff] %v2557_v0  ;;  %s2514_s28 = smov 127   ;;  %s2515_s29 = smov 113   ;;  %v2626_v44 = vand.u32 127, %v46_v42 }
   0x3   :  { %29 = vst [vmem:[#allocation1 + $0x10] ss:$2 sm:$0xff] %v2562_v1  ;;  %s2516_s30 = smov 112   ;;  %s2517_s7 = smov 111   ;;  %v2631_v46 = vld [vmem:[%s3271_s1 + $0x4] sm:$0xf] }
   0x4   :  { %vm48_vm0 = vcmp.lt.s32.totalorder %v2626_v44, 17  ;;  %v2637_v48 = vld [vmem:[%s3271_s1] sm:$0xf]  ;;  %vm87_vm1 = vcmp.lt.s32.totalorder %v2626_v44, 16  ;;  %v97_v50 = vperm.slane %v2631_v46, 2  ;;  %v98_v51 = vperm.slane %v2631_v46, 3 }
   0x5   :  { %v58_v49 = vperm.slane %v2637_v48, 3  ;;  %v57_v53 = vperm.slane %v2637_v48, 2  ;;  %v2333_v62 = vld [vmem:[%s3272_s2 + $0x4] sm:$0xf]  ;;  %vm320_vm4 = vcmp.lt.s32.totalorder %v2626_v44, 15  ;;  %vm460_vm5 = vcmp.lt.s32.totalorder %v2626_v44, 1 }
   0x6   :  { %vm704_vm6 = vcmp.lt.s32.totalorder %v2626_v44, 127  ;;  %vm844_vm7 = vcmp.lt.s32.totalorder %v2626_v44, 113  ;;  %vm984_vm8 = vcmp.lt.s32.totalorder %v2626_v44, 112  ;;  %vm1124_vm9 = vcmp.lt.s32.totalorder %v2626_v44, 111 }
   0x9   :  { %v31_v2 = vld.sshfl [vmem:[#allocation1 + $0x8] sm:$0xff pattern:$0x75316420]  ;;  %v30_v3 = vld.sshfl [vmem:[#allocation1] sm:$0xff pattern:$0x75316420] }
   0xa   :  { %40 = vrot.lane.b32.xlu1 %v31_v2, %s2510_s25  ;;  %68 = vst [vmem:[#allocation1] ss:$2 sm:$0xff] %v2557_v0  ;;  %v32_v4 = vld.sshfl [vmem:[#allocation1 + $0x10] sm:$0xff pattern:$0x75316420]  ;;  %v95_v2 = vperm.slane %v2631_v46, 0 }
   0xb   :  { %v33_v5 = vld.sshfl [vmem:[#allocation1 + $0x18] sm:$0xff pattern:$0x75316420]  ;;  %42 = vrot.lane.b32.xlu2 %v32_v4, %s2510_s25 }
   0xc   :  { %70 = vst [vmem:[#allocation1 + $0x10] ss:$2 sm:$0xff] %v2562_v1 }
  0x11   :  { %v72_v6 = vld.sshfl [vmem:[#allocation1 + $0x8] sm:$0xff pattern:$0x75316420]  ;;  %v71_v7 = vld.sshfl [vmem:[#allocation1] sm:$0xff pattern:$0x75316420] }
  0x12   :  { %81 = vrot.lane.b32.xlu0 %v72_v6, %s2511_s0  ;;  %301 = vst [vmem:[#allocation1] ss:$2 sm:$0xff] %v2557_v0  ;;  %v56_v6 = vperm.slane %v2637_v48, 1 }
  0x13   :  { %v74_v8 = vld.sshfl [vmem:[#allocation1 + $0x18] sm:$0xff pattern:$0x75316420]  ;;  %v73_v9 = vld.sshfl [vmem:[#allocation1 + $0x10] sm:$0xff pattern:$0x75316420]  ;;  %44 = vrot.lane.b32.xlu2 %v33_v5, %s2510_s25 }
  0x14   :  { %85 = vrot.lane.b32.xlu1 %v74_v8, %s2511_s0  ;;  %303 = vst [vmem:[#allocation1 + $0x10] ss:$2 sm:$0xff] %v2562_v1 }
  0x19   :  { %v304_v10 = vld.sshfl [vmem:[#allocation1] sm:$0xff pattern:$0x75316420]  ;;  %v305_v11 = vld.sshfl [vmem:[#allocation1 + $0x8] sm:$0xff pattern:$0x75316420] }
  0x1a   :  { %83 = vrot.lane.b32.xlu0 %v73_v9, %s2511_s0  ;;  %441 = vst [vmem:[#allocation1] ss:$2 sm:$0xff] %v2557_v0 }
  0x1b   :  { %v306_v12 = vld.sshfl [vmem:[#allocation1 + $0x10] sm:$0xff pattern:$0x75316420]  ;;  %v307_v13 = vld.sshfl [vmem:[#allocation1 + $0x18] sm:$0xff pattern:$0x75316420]  ;;  %314 = vrot.lane.b32.xlu2 %v305_v11, %s2512_s26 }
  0x1c   :  { %38 = vrot.lane.b32.xlu1 %v30_v3, %s2510_s25  ;;  %443 = vst [vmem:[#allocation1 + $0x10] ss:$2 sm:$0xff] %v2562_v1  ;;  %v96_v3 = vperm.slane %v2631_v46, 1 }
  0x21   :  { %v445_v14 = vld.sshfl [vmem:[#allocation1 + $0x8] sm:$0xff pattern:$0x75316420]  ;;  %v444_v15 = vld.sshfl [vmem:[#allocation1] sm:$0xff pattern:$0x75316420] }
  0x22   :  { %79 = vrot.lane.b32.xlu0 %v71_v7, %s2511_s0  ;;  %583 = vst [vmem:[#allocation1] ss:$2 sm:$0xff] %v2557_v0 }
  0x23   :  { %v446_v16 = vld.sshfl [vmem:[#allocation1 + $0x10] sm:$0xff pattern:$0x75316420]  ;;  %v447_v17 = vld.sshfl [vmem:[#allocation1 + $0x18] sm:$0xff pattern:$0x75316420]  ;;  %312 = vrot.lane.b32.xlu2 %v304_v10, %s2512_s26 }
  0x24   :  { %318 = vrot.lane.b32.xlu1 %v307_v13, %s2512_s26  ;;  %585 = vst [vmem:[#allocation1 + $0x10] ss:$2 sm:$0xff] %v2562_v1 }
  0x29   :  { %v2585_v18 = vld.sshfl [vmem:[#allocation1] sm:$0xff pattern:$0x75316420]  ;;  %v2587_v19 = vld.sshfl [vmem:[#allocation1 + $0x8] sm:$0xff pattern:$0x75316420] }
  0x2a   :  { %316 = vrot.lane.b32.xlu0 %v306_v12, %s2512_s26  ;;  %685 = vst [vmem:[#allocation1] ss:$2 sm:$0xff] %v2557_v0 }
  0x2b   :  { %v2591_v20 = vld.sshfl [vmem:[#allocation1 + $0x10] sm:$0xff pattern:$0x75316420]  ;;  %v2593_v21 = vld.sshfl [vmem:[#allocation1 + $0x18] sm:$0xff pattern:$0x75316420]  ;;  %458 = vrot.lane.b32.xlu2 %v447_v17, %s2513_s27 }
  0x2c   :  { %456 = vrot.lane.b32.xlu1 %v446_v16, %s2513_s27  ;;  %687 = vst [vmem:[#allocation1 + $0x10] ss:$2 sm:$0xff] %v2562_v1 }
  0x31   :  { %v688_v22 = vld.sshfl [vmem:[#allocation1] sm:$0xff pattern:$0x75316420]  ;;  %v689_v23 = vld.sshfl [vmem:[#allocation1 + $0x8] sm:$0xff pattern:$0x75316420] }
  0x32   :  { %454 = vrot.lane.b32.xlu0 %v445_v14, %s2513_s27  ;;  %825 = vst [vmem:[#allocation1] ss:$2 sm:$0xff] %v2557_v0 }
  0x33   :  { %v690_v24 = vld.sshfl [vmem:[#allocation1 + $0x10] sm:$0xff pattern:$0x75316420]  ;;  %v691_v25 = vld.sshfl [vmem:[#allocation1 + $0x18] sm:$0xff pattern:$0x75316420] }
  0x34   :  { %696 = vrot.lane.b32.xlu1 %v688_v22, %s2514_s28  ;;  %827 = vst [vmem:[#allocation1 + $0x10] ss:$2 sm:$0xff] %v2562_v1  ;;  %700 = vrot.lane.b32.xlu2 %v690_v24, %s2514_s28  ;;  %v67_v24 = vld [vmem:[%s3272_s2] sm:$0xf] }
  0x39   :  { %v828_v26 = vld.sshfl [vmem:[#allocation1] sm:$0xff pattern:$0x75316420]  ;;  %v829_v27 = vld.sshfl [vmem:[#allocation1 + $0x8] sm:$0xff pattern:$0x75316420] }
  0x3a   :  { %452 = vrot.lane.b32.xlu0 %v444_v15, %s2513_s27  ;;  %965 = vst [vmem:[#allocation1] ss:$2 sm:$0xff] %v2557_v0 }
  0x3b   :  { %v831_v28 = vld.sshfl [vmem:[#allocation1 + $0x18] sm:$0xff pattern:$0x75316420]  ;;  %v830_v29 = vld.sshfl [vmem:[#allocation1 + $0x10] sm:$0xff pattern:$0x75316420] }
  0x3c   :  { %698 = vrot.lane.b32.xlu1 %v689_v23, %s2514_s28  ;;  %967 = vst [vmem:[#allocation1 + $0x10] ss:$2 sm:$0xff] %v2562_v1  ;;  %836 = vrot.lane.b32.xlu2 %v828_v26, %s2515_s29 }
  0x41   :  { %v968_v30 = vld.sshfl [vmem:[#allocation1] sm:$0xff pattern:$0x75316420]  ;;  %v969_v31 = vld.sshfl [vmem:[#allocation1 + $0x8] sm:$0xff pattern:$0x75316420] }
  0x42   :  { %702 = vrot.lane.b32.xlu0 %v691_v25, %s2514_s28  ;;  %1105 = vst [vmem:[#allocation1] ss:$2 sm:$0xff] %v2557_v0 }
  0x43   :  { %v970_v32 = vld.sshfl [vmem:[#allocation1 + $0x10] sm:$0xff pattern:$0x75316420]  ;;  %v971_v33 = vld.sshfl [vmem:[#allocation1 + $0x18] sm:$0xff pattern:$0x75316420] }
  0x44   :  { %842 = vrot.lane.b32.xlu1 %v831_v28, %s2515_s29  ;;  %1107 = vst [vmem:[#allocation1 + $0x10] ss:$2 sm:$0xff] %v2562_v1  ;;  %838 = vrot.lane.b32.xlu2 %v829_v27, %s2515_s29  ;;  %v2718_v27 = vld [vmem:[%s3271_s1 + $0xc] sm:$0xf] }
  0x49   :  { %v1108_v34 = vld.sshfl [vmem:[#allocation1] sm:$0xff pattern:$0x75316420]  ;;  %v1109_v35 = vld.sshfl [vmem:[#allocation1 + $0x8] sm:$0xff pattern:$0x75316420] }
  0x4a   :  { %840 = vrot.lane.b32.xlu0 %v830_v29, %s2515_s29  ;;  %2297 = vst [vmem:[#allocation1] ss:$2 sm:$0xff] %v2557_v0  ;;  %v2670_v0 = vld [vmem:[%s3271_s1 + $0x8] sm:$0xf] }
  0x4b   :  { %v1111_v36 = vld.sshfl [vmem:[#allocation1 + $0x18] sm:$0xff pattern:$0x75316420]  ;;  %v1110_v37 = vld.sshfl [vmem:[#allocation1 + $0x10] sm:$0xff pattern:$0x75316420] }
  0x4c   :  { %980 = vrot.lane.b32.xlu1 %v970_v32, %s2516_s30  ;;  %982 = vrot.lane.b32.xlu2 %v971_v33, %s2516_s30  ;;  %2299 = vst [vmem:[#allocation1 + $0x10] ss:$2 sm:$0xff] %v2562_v1  ;;  %v55_v1 = vperm.slane %v2637_v48, 0  ;;  %v3298_v8 = vperm.slane %v2670_v0, 0  ;;  %v329_v9 = vperm.slane %v2670_v0, 1  ;;  %v3299_v28 = vperm.slane %v2670_v0, 2 }
  0x4d   :  { %v3297_v29 = vperm.slane %v2670_v0, 3 }
  0x52   :  { %976 = vrot.lane.b32.xlu0 %v968_v30, %s2516_s30 }
  0x54   :  { %1116 = vrot.lane.b32.xlu1 %v1108_v34, %s2517_s7  ;;  %1120 = vrot.lane.b32.xlu2 %v1110_v37, %s2517_s7 }
  0x5a   :  { %978 = vrot.lane.b32.xlu0 %v969_v31, %s2516_s30  ;;  %v3295_v31 = vperm.slane %v2718_v27, 3 }
  0x5c   :  { %1118 = vrot.lane.b32.xlu1 %v1109_v35, %s2517_s7 }
  0x62   :  { %1122 = vrot.lane.b32.xlu0 %v1111_v36, %s2517_s7 }
  0x65   :  { %v43_v38 = vpop.permute.xlu2 %42 }
  0x6d   :  { %v45_v39 = vpop.permute.xlu2 %44 }
  0x6e   :  { %v49_v52 = vsel %vm48_vm0, %v43_v38, %v45_v39 }
  0x6f   :  { %v66_v58 = vmul.f32 %v58_v49, %v49_v52 }
  0x75   :  { %v2624_v41 = vpop.permute.xlu2 %314 }
  0x7c   :  { %v41_v40 = vpop.permute.xlu1 %40 }
  0x7d   :  { %v313_v47 = vpop.permute.xlu2 %312  ;;  %v50_v55 = vsel %vm48_vm0, %v41_v40, %v43_v38 }
  0x7e   :  { %v65_v63 = vmul.f32 %v57_v53, %v50_v55  ;;  %v323_v13 = vsel %vm320_vm4, %v313_v47, %v2624_v41  ;;  %v3292_v55 = vperm.slane %v2718_v27, 1 }
  0x7f   :  { %v337_v26 = vmul.f32 %v329_v9, %v323_v13 }
  0x84   :  { %v82_v43 = vpop.permute.xlu0 %81 }
  0x85   :  { %v2678_v4 = vpop.permute.xlu2 %458 }
  0x86   :  { %v86_v45 = vpop.permute.xlu1 %85 }
  0x8c   :  { %v84_v54 = vpop.permute.xlu0 %83 }
  0x8d   :  { %v88_v56 = vsel %vm87_vm1, %v84_v54, %v86_v45  ;;  %v89_v57 = vsel %vm87_vm1, %v82_v43, %v84_v54  ;;  %v2361_v54 = vld [vmem:[%s3272_s2 + $0xc] sm:$0xf] }
  0x8e   :  { %v39_v59 = vpop.permute.xlu1 %38  ;;  %v105_v60 = vmul.f32 %v97_v50, %v89_v57  ;;  %v106_v61 = vmul.f32 %v98_v51, %v88_v56  ;;  %v2730_v32 = vpop.permute.xlu2 %700  ;;  %v2778_v56 = vld [vmem:[%s3271_s1 + $0x14] sm:$0xf] }
  0x8f   :  { %v52_v5 = vsel %vm48_vm0, %v45_v39, %v39_v59  ;;  %v51_v10 = vsel %vm48_vm0, %v39_v59, %v41_v40  ;;  %v2351_v39 = vld [vmem:[%s3272_s2 + $0x8] sm:$0xf] }
  0x90   :  { %2338 = vmatpush.msk.msra.mxu2 %vm113_vm2, %v105_v60  ;;  %2340 = vmatpush.msk.msra.mxu3 %vm113_vm2, %v106_v61  ;;  %v63_v14 = vmul.f32 %v55_v1, %v52_v5  ;;  %v64_v23 = vmul.f32 %v56_v6, %v51_v10 }
  0x91   :  { %2339 = vmatmul.msk.f32.vlgmr.msra.gmra.mxu2 %vm109_vm3, %v2333_v62  ;;  %2341 = vmatmul.msk.f32.vlgmr.msra.gmra.mxu3 %vm109_vm3, %v2333_v62 }
  0x92   :  { %2346 = vmatpush.msk.msrb.mxu2 %vm113_vm2, %v65_v63  ;;  %2348 = vmatpush.msk.msrb.mxu3 %vm113_vm2, %v66_v58  ;;  %v3290_v58 = vperm.slane %v2778_v56, 1 }
  0x94   :  { %v80_v7 = vpop.permute.xlu0 %79 }
  0x95   :  { %v90_v11 = vsel %vm87_vm1, %v80_v7, %v82_v43  ;;  %v91_v12 = vsel %vm87_vm1, %v86_v45, %v80_v7 }
  0x96   :  { %v319_v15 = vpop.permute.xlu1 %318  ;;  %v103_v16 = vmul.f32 %v95_v2, %v91_v12  ;;  %v104_v17 = vmul.f32 %v96_v3, %v90_v11  ;;  %v837_v52 = vpop.permute.xlu2 %836  ;;  %v2370_v11 = vld [vmem:[%s3272_s2 + $0x10] sm:$0xf] }
  0x97   :  { %v324_v22 = vsel %vm320_vm4, %v319_v15, %v313_v47 }
  0x98   :  { %2334 = vmatpush.msk.msra.mxu0 %vm113_vm2, %v103_v16  ;;  %2336 = vmatpush.msk.msra.mxu1 %vm113_vm2, %v104_v17  ;;  %v336_v25 = vmul.f32 %v3298_v8, %v324_v22 }
  0x99   :  { %2335 = vmatmul.msk.f32.vlgmr.msra.gmra.mxu0 %vm109_vm3, %v2333_v62  ;;  %2337 = vmatmul.msk.f32.vlgmr.msra.gmra.mxu1 %vm109_vm3, %v2333_v62  ;;  %v3291_v62 = vperm.slane %v2778_v56, 0 }
  0x9a   :  { %2342 = vmatpush.msk.msrb.mxu0 %vm113_vm2, %v63_v14  ;;  %2344 = vmatpush.msk.msrb.mxu1 %vm113_vm2, %v64_v23  ;;  %v3289_v14 = vperm.slane %v2778_v56, 2 }
  0x9b   :  { %2347 = vmatmul.msk.f32.vlgmr.msrb.gmra.mxu2 %vm109_vm3, %v67_v24  ;;  %2349 = vmatmul.msk.f32.vlgmr.msrb.gmra.mxu3 %vm109_vm3, %v67_v24 }
  0x9c   :  { %v317_v30 = vpop.permute.xlu0 %316  ;;  %2352 = vmatpush.msk.msra.mxu0 %vm113_vm2, %v336_v25  ;;  %2354 = vmatpush.msk.msra.mxu1 %vm113_vm2, %v337_v26 }
  0x9d   :  { %v321_v33 = vsel %vm320_vm4, %v317_v30, %v319_v15  ;;  %v322_v34 = vsel %vm320_vm4, %v2624_v41, %v317_v30  ;;  %v3296_v41 = vperm.slane %v2718_v27, 2  ;;  %v3294_v15 = vperm.slane %v2778_v56, 3 }
  0x9e   :  { %v457_v35 = vpop.permute.xlu1 %456  ;;  %v338_v36 = vmul.f32 %v3299_v28, %v322_v34  ;;  %v339_v37 = vmul.f32 %v3297_v29, %v321_v33  ;;  %v839_v12 = vpop.permute.xlu2 %838 }
  0x9f   :  { %v461_v38 = vsel %vm460_vm5, %v457_v35, %v2678_v4  ;;  %v847_v17 = vsel %vm844_vm7, %v837_v52, %v839_v12 }
  0xa0   :  { %2356 = vmatpush.msk.msra.mxu2 %vm113_vm2, %v338_v36  ;;  %2358 = vmatpush.msk.msra.mxu3 %vm113_vm2, %v339_v37  ;;  %v479_v40 = vmul.f32 %v3295_v31, %v461_v38  ;;  %v1245_v38 = vld [vmem:[%s3273_s3] sm:$0xf] }
  0xa1   :  { %2343 = vmatmul.msk.f32.vlgmr.msrb.gmra.mxu0 %vm109_vm3, %v67_v24  ;;  %2345 = vmatmul.msk.f32.vlgmr.msrb.gmra.mxu1 %vm109_vm3, %v67_v24 }
  0xa2   :  { %2368 = vmatpush.msk.msrb.mxu3 %vm113_vm2, %v479_v40 }
  0xa3   :  { %2357 = vmatmul.msk.f32.vlgmr.msra.gmra.mxu2 %vm109_vm3, %v2351_v39  ;;  %2359 = vmatmul.msk.f32.vlgmr.msra.gmra.mxu3 %vm109_vm3, %v2351_v39 }
  0xa4   :  { %v455_v42 = vpop.permute.xlu0 %454  ;;  %2377 = vmatpush.msk.msra.mxu3 %vm113_vm2, %v2593_v21  ;;  %v3293_v21 = vperm.slane %v2718_v27, 0 }
  0xa5   :  { %v462_v43 = vsel %vm460_vm5, %v455_v42, %v457_v35  ;;  %v2853_v35 = vld [vmem:[%s3271_s1 + $0x1c] sm:$0xf] }
  0xa6   :  { %v478_v45 = vmul.f32 %v3296_v41, %v462_v43  ;;  %v697_v47 = vpop.permute.xlu1 %696  ;;  %v3284_v40 = vperm.slane %v2853_v35, 2  ;;  %v2518_v43 = vmov 0  }
  0xa7   :  { %2508 = vset.pattern.permute.xlu2 %v2518_v43  ;;  %2509 = vset.pattern.permute.xlu0 %v2518_v43 }
  0xa8   :  { %2366 = vmatpush.msk.msrb.mxu2 %vm113_vm2, %v478_v45  ;;  %1248 = vperm.xlu2 %2508, %v1245_v38  }
  0xa9   :  { %2353 = vmatmul.msk.f32.vlgmr.msra.gmra.mxu0 %vm109_vm3, %v2351_v39  ;;  %2355 = vmatmul.msk.f32.vlgmr.msra.gmra.mxu1 %vm109_vm3, %v2351_v39 }
  0xaa   :  { %2375 = vmatpush.msk.msra.mxu2 %vm113_vm2, %v2591_v20 }
  0xab   :  { %2367 = vmatmul.msk.f32.vlgmr.msrb.gmra.mxu2 %vm109_vm3, %v2361_v54  ;;  %2369 = vmatmul.msk.f32.vlgmr.msrb.gmra.mxu3 %vm109_vm3, %v2361_v54 }
  0xac   :  { %v453_v57 = vpop.permute.xlu0 %452 }
  0xad   :  { %v463_v59 = vsel %vm460_vm5, %v453_v57, %v455_v42  ;;  %v464_v20 = vsel %vm460_vm5, %v2678_v4, %v453_v57  ;;  %v2800_v4 = vld [vmem:[%s3271_s1 + $0x18] sm:$0xf]  ;;  %v983_v42 = vpop.permute.xlu2 %982 }
  0xae   :  { %v476_v60 = vmul.f32 %v3293_v21, %v464_v20  ;;  %v477_v61 = vmul.f32 %v3292_v55, %v463_v59  ;;  %v699_v63 = vpop.permute.xlu1 %698  ;;  %v3288_v16 = vperm.slane %v2800_v4, 0  ;;  %v3286_v36 = vperm.slane %v2800_v4, 2  ;;  %v2390_v20 = vld [vmem:[%s3272_s2 + $0x18] sm:$0xf] }
  0xaf   :  { %v706_v5 = vsel %vm704_vm6, %v699_v63, %v2730_v32  ;;  %v707_v7 = vsel %vm704_vm6, %v697_v47, %v699_v63  ;;  %v3287_v37 = vperm.slane %v2800_v4, 1 }
  0xb0   :  { %v721_v10 = vmul.f32 %v3290_v58, %v706_v5  ;;  %2362 = vmatpush.msk.msrb.mxu0 %vm113_vm2, %v476_v60  ;;  %2364 = vmatpush.msk.msrb.mxu1 %vm113_vm2, %v477_v61  ;;  %v720_v13 = vmul.f32 %v3291_v62, %v707_v7  ;;  %v860_v30 = vmul.f32 %v3288_v16, %v847_v17  ;;  %v3283_v61 = vperm.slane %v2853_v35, 3 }
  0xb1   :  { %2363 = vmatmul.msk.f32.vlgmr.msrb.gmra.mxu0 %vm109_vm3, %v2361_v54  ;;  %2365 = vmatmul.msk.f32.vlgmr.msrb.gmra.mxu1 %vm109_vm3, %v2361_v54  ;;  %v3280_v17 = vperm.slane %v2853_v35, 1 }
  0xb2   :  { %2371 = vmatpush.msk.msra.mxu0 %vm113_vm2, %v2585_v18  ;;  %2373 = vmatpush.msk.msra.mxu1 %vm113_vm2, %v2587_v19  ;;  %v3285_v18 = vperm.slane %v2800_v4, 3 }
  0xb3   :  { %2376 = vmatmul.msk.f32.vlgmr.msra.gmra.mxu2 %vm109_vm3, %v2370_v11  ;;  %2378 = vmatmul.msk.f32.vlgmr.msra.gmra.mxu3 %vm109_vm3, %v2370_v11 }
  0xb4   :  { %2381 = vmatpush.msk.msrb.mxu0 %vm113_vm2, %v720_v13  ;;  %v703_v22 = vpop.permute.xlu0 %702  ;;  %2383 = vmatpush.msk.msrb.mxu1 %vm113_vm2, %v721_v10  ;;  %v3281_v13 = vperm.slane %v2853_v35, 0 }
  0xb5   :  { %v705_v19 = vsel %vm704_vm6, %v2730_v32, %v703_v22  ;;  %v708_v23 = vsel %vm704_vm6, %v703_v22, %v697_v47  ;;  %v2380_v32 = vld [vmem:[%s3272_s2 + $0x14] sm:$0xf] }
  0xb6   :  { %v722_v24 = vmul.f32 %v3289_v14, %v705_v19  ;;  %v723_v25 = vmul.f32 %v3294_v15, %v708_v23  ;;  %v843_v26 = vpop.permute.xlu1 %842 }
  0xb7   :  { %v848_v33 = vsel %vm844_vm7, %v843_v26, %v837_v52 }
  0xb8   :  { %v863_v34 = vmul.f32 %v3285_v18, %v848_v33  ;;  %2385 = vmatpush.msk.msrb.mxu2 %vm113_vm2, %v722_v24  ;;  %2387 = vmatpush.msk.msrb.mxu3 %vm113_vm2, %v723_v25  ;;  %v1121_v24 = vpop.permute.xlu2 %1120 }
  0xb9   :  { %2372 = vmatmul.msk.f32.vlgmr.msra.gmra.mxu0 %vm109_vm3, %v2370_v11  ;;  %2374 = vmatmul.msk.f32.vlgmr.msra.gmra.mxu1 %vm109_vm3, %v2370_v11  ;;  %v2400_v11 = vld [vmem:[%s3272_s2 + $0x1c] sm:$0xf] }
  0xba   :  { %2391 = vmatpush.msk.msra.mxu0 %vm113_vm2, %v860_v30  ;;  %2397 = vmatpush.msk.msra.mxu3 %vm113_vm2, %v863_v34 }
  0xbb   :  { %2386 = vmatmul.msk.f32.vlgmr.msrb.gmra.mxu2 %vm109_vm3, %v2380_v32  ;;  %2388 = vmatmul.msk.f32.vlgmr.msrb.gmra.mxu3 %vm109_vm3, %v2380_v32 }
  0xbc   :  { %v841_v39 = vpop.permute.xlu0 %840 }
  0xbd   :  { %v845_v45 = vsel %vm844_vm7, %v841_v39, %v843_v26  ;;  %v846_v47 = vsel %vm844_vm7, %v839_v12, %v841_v39  ;;  %v2902_v12 = vld [vmem:[%s3271_s1 + $0x20] sm:$0xf] }
  0xbe   :  { %v862_v52 = vmul.f32 %v3286_v36, %v845_v45  ;;  %v981_v54 = vpop.permute.xlu1 %980  ;;  %v861_v57 = vmul.f32 %v3287_v37, %v846_v47  ;;  %v3279_v19 = vperm.slane %v2902_v12, 0  ;;  %v3278_v23 = vperm.slane %v2902_v12, 1 }
  0xbf   :  { %v985_v59 = vsel %vm984_vm8, %v981_v54, %v983_v42  ;;  %v3277_v43 = vperm.slane %v2902_v12, 2  ;;  %v3282_v45 = vperm.slane %v2902_v12, 3 }
  0xc0   :  { %2393 = vmatpush.msk.msra.mxu1 %vm113_vm2, %v861_v57  ;;  %2395 = vmatpush.msk.msra.mxu2 %vm113_vm2, %v862_v52  ;;  %v1002_v60 = vmul.f32 %v3284_v40, %v985_v59 }
  0xc1   :  { %2382 = vmatmul.msk.f32.vlgmr.msrb.gmra.mxu0 %vm109_vm3, %v2380_v32  ;;  %2384 = vmatmul.msk.f32.vlgmr.msrb.gmra.mxu1 %vm109_vm3, %v2380_v32 }
  0xc2   :  { %2405 = vmatpush.msk.msrb.mxu2 %vm113_vm2, %v1002_v60 }
  0xc3   :  { %2396 = vmatmul.msk.f32.vlgmr.msra.gmra.mxu2 %vm109_vm3, %v2390_v20  ;;  %2398 = vmatmul.msk.f32.vlgmr.msra.gmra.mxu3 %vm109_vm3, %v2390_v20 }
  0xc4   :  { %v977_v63 = vpop.permute.xlu0 %976 }
  0xc5   :  { %v988_v5 = vsel %vm984_vm8, %v983_v42, %v977_v63 }
  0xc6   :  { %v1003_v7 = vmul.f32 %v3283_v61, %v988_v5  ;;  %v1117_v10 = vpop.permute.xlu1 %1116 }
  0xc8   :  { %2407 = vmatpush.msk.msrb.mxu3 %vm113_vm2, %v1003_v7 }
  0xc9   :  { %2392 = vmatmul.msk.f32.vlgmr.msra.gmra.mxu0 %vm109_vm3, %v2390_v20  ;;  %2394 = vmatmul.msk.f32.vlgmr.msra.gmra.mxu1 %vm109_vm3, %v2390_v20  ;;  %v2410_v20 = vld [vmem:[%s3272_s2 + $0x20] sm:$0xf] }
  0xcb   :  { %2406 = vmatmul.msk.f32.vlgmr.msrb.gmra.mxu2 %vm109_vm3, %v2400_v11  ;;  %2408 = vmatmul.msk.f32.vlgmr.msrb.gmra.mxu3 %vm109_vm3, %v2400_v11 }
  0xcc   :  { %v979_v22 = vpop.permute.xlu0 %978 }
  0xcd   :  { %v986_v25 = vsel %vm984_vm8, %v979_v22, %v981_v54  ;;  %v987_v26 = vsel %vm984_vm8, %v977_v63, %v979_v22 }
  0xce   :  { %v1000_v30 = vmul.f32 %v3281_v13, %v987_v26  ;;  %v1001_v33 = vmul.f32 %v3280_v17, %v986_v25  ;;  %v1119_v34 = vpop.permute.xlu1 %1118 }
  0xcf   :  { %v1127_v32 = vsel %vm1124_vm9, %v1117_v10, %v1119_v34  ;;  %v1126_v38 = vsel %vm1124_vm9, %v1119_v34, %v1121_v24 }
  0xd0   :  { %v1140_v39 = vmul.f32 %v3279_v19, %v1127_v32  ;;  %2401 = vmatpush.msk.msrb.mxu0 %vm113_vm2, %v1000_v30  ;;  %2403 = vmatpush.msk.msrb.mxu1 %vm113_vm2, %v1001_v33  ;;  %v1141_v42 = vmul.f32 %v3278_v23, %v1126_v38 }
  0xd1   :  { %2402 = vmatmul.msk.f32.vlgmr.msrb.gmra.mxu0 %vm109_vm3, %v2400_v11  ;;  %2404 = vmatmul.msk.f32.vlgmr.msrb.gmra.mxu1 %vm109_vm3, %v2400_v11 }
  0xd2   :  { %2411 = vmatpush.msk.msra.mxu0 %vm113_vm2, %v1140_v39  ;;  %2413 = vmatpush.msk.msra.mxu1 %vm113_vm2, %v1141_v42 }
  0xd4   :  { %v1123_v47 = vpop.permute.xlu0 %1122 }
  0xd5   :  { %v1125_v52 = vsel %vm1124_vm9, %v1121_v24, %v1123_v47  ;;  %v1128_v54 = vsel %vm1124_vm9, %v1123_v47, %v1117_v10 }
  0xd6   :  { %v1142_v57 = vmul.f32 %v3277_v43, %v1125_v52  ;;  %v1143_v59 = vmul.f32 %v3282_v45, %v1128_v54 }
  0xd8   :  { %2415 = vmatpush.msk.msra.mxu2 %vm113_vm2, %v1142_v57  ;;  %2417 = vmatpush.msk.msra.mxu3 %vm113_vm2, %v1143_v59 }
  0xd9   :  { %2412 = vmatmul.msk.f32.vlgmr.msra.gmra.mxu0 %vm109_vm3, %v2410_v20  ;;  %2414 = vmatmul.msk.f32.vlgmr.msra.gmra.mxu1 %vm109_vm3, %v2410_v20 }
  0xda   :  { %2416 = vmatmul.msk.f32.vlgmr.msra.gmra.mxu2 %vm109_vm3, %v2410_v20  ;;  %2418 = vmatmul.msk.f32.vlgmr.msra.gmra.mxu3 %vm109_vm3, %v2410_v20 }
 0x114   :  { %v183_v60 = vpop.f32.mrf.mxu2  ;;  %v203_v63 = vpop.f32.mrf.mxu3 }
 0x116   :  { %v143_v5 = vpop.f32.mrf.mxu0  ;;  %v163_v7 = vpop.f32.mrf.mxu1 }
 0x11e   :  { %v278_v10 = vpop.f32.mrf.mxu2  ;;  %v298_v11 = vpop.f32.mrf.mxu3 }
 0x11f   :  { %v238_v22 = vpop.f32.mrf.mxu0  ;;  %v258_v24 = vpop.f32.mrf.mxu1  ;;  %v299_v36 = vadd.f32 %v298_v11, %v203_v63  ;;  %v279_v62 = vadd.f32 %v278_v10, %v183_v60  ;;  %v2287_v10 = vld [vmem:[%s3274_s5] sm:$0xf] }
 0x120   :  { %v259_v17 = vadd.f32 %v258_v24, %v163_v7  ;;  %v239_v13 = vadd.f32 %v238_v22, %v143_v5 }
 0x126   :  { %v414_v25 = vpop.f32.mrf.mxu2  ;;  %v434_v26 = vpop.f32.mrf.mxu3 }
 0x127   :  { %v374_v30 = vpop.f32.mrf.mxu0  ;;  %v394_v33 = vpop.f32.mrf.mxu1  ;;  %v439_v15 = vadd.f32 %v414_v25, %v279_v62  ;;  %v440_v31 = vadd.f32 %v434_v26, %v299_v36 }
 0x128   :  { %v437_v40 = vadd.f32 %v374_v30, %v239_v13  ;;  %v438_v18 = vadd.f32 %v394_v33, %v259_v17 }
 0x12e   :  { %v554_v34 = vpop.f32.mrf.mxu2  ;;  %v574_v32 = vpop.f32.mrf.mxu3 }
 0x12f   :  { %v514_v38 = vpop.f32.mrf.mxu0  ;;  %v534_v39 = vpop.f32.mrf.mxu1  ;;  %v579_v8 = vadd.f32 %v554_v34, %v439_v15  ;;  %v580_v28 = vadd.f32 %v574_v32, %v440_v31 }
 0x130   :  { %v577_v37 = vadd.f32 %v514_v38, %v437_v40  ;;  %v578_v16 = vadd.f32 %v534_v39, %v438_v18  ;;  %v1249_v18 = vpop.permute.xlu2 %1248 }
 0x136   :  { %v658_v42 = vpop.f32.mrf.mxu2  ;;  %v678_v47 = vpop.f32.mrf.mxu3 }
 0x137   :  { %v618_v52 = vpop.f32.mrf.mxu0  ;;  %v638_v54 = vpop.f32.mrf.mxu1  ;;  %v683_v13 = vadd.f32 %v658_v42, %v579_v8  ;;  %v684_v17 = vadd.f32 %v678_v47, %v580_v28  ;;  %v2419_v42 = vld [vmem:[%s3275_s4 + $0x4] sm:$0xf] }
 0x138   :  { %v681_v55 = vadd.f32 %v618_v52, %v577_v37  ;;  %v682_v21 = vadd.f32 %v638_v54, %v578_v16 }
 0x13e   :  { %v798_v20 = vpop.f32.mrf.mxu2  ;;  %v818_v43 = vpop.f32.mrf.mxu3 }
 0x13f   :  { %v758_v57 = vpop.f32.mrf.mxu0  ;;  %v778_v59 = vpop.f32.mrf.mxu1  ;;  %v823_v60 = vadd.f32 %v798_v20, %v683_v13  ;;  %v824_v37 = vadd.f32 %v818_v43, %v684_v17 }
 0x140   :  { %v821_v41 = vadd.f32 %v758_v57, %v681_v55  ;;  %v822_v29 = vadd.f32 %v778_v59, %v682_v21 }
 0x146   :  { %v938_v45 = vpop.f32.mrf.mxu2  ;;  %v958_v61 = vpop.f32.mrf.mxu3 }
 0x147   :  { %v898_v23 = vpop.f32.mrf.mxu0  ;;  %v918_v19 = vpop.f32.mrf.mxu1  ;;  %v963_v36 = vadd.f32 %v938_v45, %v823_v60  ;;  %v964_v55 = vadd.f32 %v958_v61, %v824_v37 }
 0x148   :  { %v961_v7 = vadd.f32 %v898_v23, %v821_v41  ;;  %v962_v5 = vadd.f32 %v918_v19, %v822_v29 }
 0x14e   :  { %v1078_v22 = vpop.f32.mrf.mxu2  ;;  %v1098_v24 = vpop.f32.mrf.mxu3 }
 0x14f   :  { %v1038_v14 = vpop.f32.mrf.mxu0  ;;  %v1058_v58 = vpop.f32.mrf.mxu1  ;;  %v1103_v31 = vadd.f32 %v1078_v22, %v963_v36  ;;  %v1104_v41 = vadd.f32 %v1098_v24, %v964_v55  ;;  %v3301_v36 = vperm.slane %v2670_v0, 0 }
 0x150   :  { %v1101_v63 = vadd.f32 %v1038_v14, %v961_v7  ;;  %v1102_v40 = vadd.f32 %v1058_v58, %v962_v5 }
 0x157   :  { %v1178_v11 = vpop.f32.mrf.mxu0  ;;  %v1198_v30 = vpop.f32.mrf.mxu1 }
 0x158   :  { %v1241_v16 = vadd.f32 %v1178_v11, %v1101_v63  ;;  %v1242_v62 = vadd.f32 %v1198_v30, %v1102_v40  ;;  %v3300_v30 = vperm.slane %v2670_v0, 2 }
 0x15a   :  { %v1251_v21 = vadd.f32 %v1249_v18, %v1241_v16  ;;  %v1252_v15 = vadd.f32 %v1249_v18, %v1242_v62 }
 0x15c   :  { %v2952_v29 = vmax.f32 %v1251_v21, 0.0  ;;  %v2954_v19 = vmax.f32 %v1252_v15, 0.0  ;;  %v3302_v21 = vperm.slane %v2670_v0, 3 }
 0x15d   :  { %v1218_v8 = vpop.f32.mrf.mxu2  ;;  %v1238_v28 = vpop.f32.mrf.mxu3 }
 0x15e   :  { %v1243_v58 = vadd.f32 %v1218_v8, %v1103_v31  ;;  %v1244_v14 = vadd.f32 %v1238_v28, %v1104_v41  ;;  %1278 = vrot.lane.b32.xlu2 %v2954_v19, %s2511_s0  ;;  %1259 = vrot.lane.b32.xlu1 %v2952_v29, %s2510_s25  ;;  %v3303_v28 = vperm.slane %v2718_v27, 2 }
 0x15f   :  { %1276 = vrot.lane.b32.xlu0 %v2952_v29, %s2511_s0 }
 0x160   :  { %v1254_v61 = vadd.f32 %v1249_v18, %v1244_v14  ;;  %v1253_v23 = vadd.f32 %v1249_v18, %v1243_v58  ;;  %v1275_v18 = vld [vmem:[%s3275_s4] sm:$0xf]  ;;  %v3304_v14 = vperm.slane %v2718_v27, 3 }
 0x162   :  { %v2962_v43 = vmax.f32 %v1254_v61, 0.0  ;;  %v2964_v45 = vmax.f32 %v1253_v23, 0.0  ;;  %v2445_v23 = vld [vmem:[%s3275_s4 + $0xc] sm:$0xf] }
 0x166   :  { %1484 = vrot.lane.b32.xlu2 %v2952_v29, %s2512_s26  ;;  %1282 = vrot.lane.b32.xlu1 %v2962_v43, %s2511_s0 }
 0x167   :  { %1280 = vrot.lane.b32.xlu0 %v2964_v45, %s2511_s0 }
 0x16e   :  { %1265 = vrot.lane.b32.xlu2 %v2962_v43, %s2510_s25  ;;  %1263 = vrot.lane.b32.xlu1 %v2964_v45, %s2510_s25 }
 0x16f   :  { %1261 = vrot.lane.b32.xlu0 %v2954_v19, %s2510_s25 }
 0x176   :  { %1488 = vrot.lane.b32.xlu2 %v2964_v45, %s2512_s26  ;;  %1486 = vrot.lane.b32.xlu1 %v2954_v19, %s2512_s26 }
 0x177   :  { %1490 = vrot.lane.b32.xlu0 %v2962_v43, %s2512_s26 }
 0x17e   :  { %1603 = vrot.lane.b32.xlu2 %v2954_v19, %s2513_s27  ;;  %1607 = vrot.lane.b32.xlu1 %v2962_v43, %s2513_s27 }
 0x17f   :  { %1605 = vrot.lane.b32.xlu0 %v2964_v45, %s2513_s27 }
 0x186   :  { %1936 = vrot.lane.b32.xlu2 %v2952_v29, %s2515_s29  ;;  %1819 = vrot.lane.b32.xlu1 %v2952_v29, %s2514_s28 }
 0x187   :  { %1601 = vrot.lane.b32.xlu0 %v2952_v29, %s2513_s27 }
 0x18e   :  { %1825 = vrot.lane.b32.xlu2 %v2962_v43, %s2514_s28  ;;  %1821 = vrot.lane.b32.xlu1 %v2954_v19, %s2514_s28 }
 0x18f   :  { %1823 = vrot.lane.b32.xlu0 %v2964_v45, %s2514_s28 }
 0x196   :  { %1938 = vrot.lane.b32.xlu2 %v2954_v19, %s2515_s29  ;;  %1940 = vrot.lane.b32.xlu1 %v2964_v45, %s2515_s29 }
 0x197   :  { %1942 = vrot.lane.b32.xlu0 %v2962_v43, %s2515_s29 }
 0x19e   :  { %2057 = vrot.lane.b32.xlu2 %v2964_v45, %s2516_s30  ;;  %2059 = vrot.lane.b32.xlu1 %v2962_v43, %s2516_s30 }
 0x19f   :  { %2053 = vrot.lane.b32.xlu0 %v2952_v29, %s2516_s30 }
 0x1a6   :  { %2176 = vrot.lane.b32.xlu2 %v2962_v43, %s2517_s7  ;;  %2170 = vrot.lane.b32.xlu1 %v2952_v29, %s2517_s7 }
 0x1a7   :  { %2055 = vrot.lane.b32.xlu0 %v2954_v19, %s2516_s30 }
 0x1ae   :  { %2290 = vperm.xlu2 %2508, %v2287_v10   ;;  %2172 = vrot.lane.b32.xlu1 %v2954_v19, %s2517_s7 }
 0x1af   :  { %2174 = vrot.lane.b32.xlu0 %v2964_v45, %s2517_s7 }
 0x1b8   :  { %v1279_v25 = vpop.permute.xlu2 %1278 }
 0x1c0   :  { %v1485_v26 = vpop.permute.xlu2 %1484 }
 0x1c8   :  { %v1266_v33 = vpop.permute.xlu2 %1265 }
 0x1d0   :  { %v1260_v34 = vpop.permute.xlu1 %1259  ;;  %v1489_v47 = vpop.permute.xlu2 %1488 }
 0x1d1   :  { %v1277_v32 = vpop.permute.xlu0 %1276  ;;  %v1270_v59 = vsel %vm48_vm0, %v1266_v33, %v1260_v34 }
 0x1d2   :  { %v1286_v38 = vsel %vm87_vm1, %v1277_v32, %v1279_v25  ;;  %v1271_v24 = vmul.f32 %v1270_v59, %v55_v1 }
 0x1d3   :  { %v1289_v39 = vmul.f32 %v1286_v38, %v96_v3 }
 0x1d5   :  { %2422 = vmatpush.msk.msrb.mxu1 %vm113_vm2, %v1289_v39 }
 0x1d6   :  { %2423 = vmatmul.msk.f32.vlgmr.msrb.gmra.mxu1 %vm109_vm3, %v2419_v42 }
 0x1d8   :  { %v1283_v52 = vpop.permute.xlu1 %1282  ;;  %v1604_v46 = vpop.permute.xlu2 %1603 }
 0x1d9   :  { %v1287_v54 = vsel %vm87_vm1, %v1283_v52, %v1277_v32  ;;  %v1281_v57 = vpop.permute.xlu0 %1280 }
 0x1da   :  { %v1288_v3 = vmul.f32 %v1287_v54, %v95_v2  ;;  %v1284_v20 = vsel %vm87_vm1, %v1281_v57, %v1283_v52  ;;  %v1285_v7 = vsel %vm87_vm1, %v1279_v25, %v1281_v57  ;;  %v2454_v52 = vld [vmem:[%s3275_s4 + $0x10] sm:$0xf] }
 0x1db   :  { %v1290_v5 = vmul.f32 %v1285_v7, %v97_v50  ;;  %v1291_v22 = vmul.f32 %v1284_v20, %v98_v51  ;;  %v3308_v20 = vperm.slane %v2778_v56, 0 }
 0x1dc   :  { %2420 = vmatpush.msk.msrb.mxu0 %vm113_vm2, %v1288_v3 }
 0x1dd   :  { %2424 = vmatpush.msk.msrb.mxu2 %vm113_vm2, %v1290_v5  ;;  %2426 = vmatpush.msk.msrb.mxu3 %vm113_vm2, %v1291_v22  ;;  %v3309_v5 = vperm.slane %v2778_v56, 1 }
 0x1de   :  { %2425 = vmatmul.msk.f32.vlgmr.msrb.gmra.mxu2 %vm109_vm3, %v2419_v42  ;;  %2427 = vmatmul.msk.f32.vlgmr.msrb.gmra.mxu3 %vm109_vm3, %v2419_v42 }
 0x1df   :  { %2428 = vmatpush.msk.msra.mxu0 %vm113_vm2, %v1271_v24  ;;  %v3310_v24 = vperm.slane %v2778_v56, 2 }
 0x1e0   :  { %v1264_v2 = vpop.permute.xlu1 %1263  ;;  %2421 = vmatmul.msk.f32.vlgmr.msrb.gmra.mxu0 %vm109_vm3, %v2419_v42  ;;  %v3093_v62 = vpop.permute.xlu2 %1936  ;;  %v3306_v42 = vperm.slane %v2718_v27, 0 }
 0x1e1   :  { %v1267_v50 = vsel %vm48_vm0, %v1264_v2, %v1266_v33  ;;  %v1262_v51 = vpop.permute.xlu0 %1261 }
 0x1e2   :  { %v1274_v1 = vmul.f32 %v1267_v50, %v58_v49  ;;  %v1268_v13 = vsel %vm48_vm0, %v1262_v51, %v1264_v2  ;;  %v1269_v17 = vsel %vm48_vm0, %v1260_v34, %v1262_v51  ;;  %v3305_v34 = vperm.slane %v2778_v56, 3  ;;  %v2463_v51 = vld [vmem:[%s3275_s4 + $0x14] sm:$0xf] }
 0x1e3   :  { %v1272_v63 = vmul.f32 %v1269_v17, %v56_v6  ;;  %v1273_v40 = vmul.f32 %v1268_v13, %v57_v53  ;;  %v3312_v17 = vperm.slane %v2800_v4, 1 }
 0x1e4   :  { %2434 = vmatpush.msk.msra.mxu3 %vm113_vm2, %v1274_v1 }
 0x1e5   :  { %2430 = vmatpush.msk.msra.mxu1 %vm113_vm2, %v1272_v63  ;;  %2432 = vmatpush.msk.msra.mxu2 %vm113_vm2, %v1273_v40 }
 0x1e6   :  { %2433 = vmatmul.msk.f32.vlgmr.msra.gmra.mxu2 %vm109_vm3, %v1275_v18  ;;  %2435 = vmatmul.msk.f32.vlgmr.msra.gmra.mxu3 %vm109_vm3, %v1275_v18 }
 0x1e7   :  { %2431 = vmatmul.msk.f32.vlgmr.msra.gmra.mxu1 %vm109_vm3, %v1275_v18 }
 0x1e8   :  { %v1487_v49 = vpop.permute.xlu1 %1486  ;;  %2429 = vmatmul.msk.f32.vlgmr.msra.gmra.mxu0 %vm109_vm3, %v1275_v18  ;;  %v1826_v10 = vpop.permute.xlu2 %1825 }
 0x1e9   :  { %v1493_v48 = vsel %vm320_vm4, %v1487_v49, %v1489_v47  ;;  %v1494_v53 = vsel %vm320_vm4, %v1485_v26, %v1487_v49  ;;  %v1491_v6 = vpop.permute.xlu0 %1490  ;;  %v3313_v49 = vperm.slane %v2800_v4, 2 }
 0x1ea   :  { %v1497_v11 = vmul.f32 %v1494_v53, %v329_v9  ;;  %v1498_v60 = vmul.f32 %v1493_v48, %v3300_v30  ;;  %v1492_v37 = vsel %vm320_vm4, %v1489_v47, %v1491_v6  ;;  %v1495_v16 = vsel %vm320_vm4, %v1491_v6, %v1485_v26  ;;  %v2436_v9 = vld [vmem:[%s3275_s4 + $0x8] sm:$0xf] }
 0x1eb   :  { %v1496_v55 = vmul.f32 %v1495_v16, %v3301_v36  ;;  %v1499_v15 = vmul.f32 %v1492_v37, %v3302_v21  ;;  %v3307_v47 = vperm.slane %v2718_v27, 1  ;;  %v3314_v53 = vperm.slane %v2800_v4, 3 }
 0x1ec   :  { %2439 = vmatpush.msk.msrb.mxu1 %vm113_vm2, %v1497_v11  ;;  %2441 = vmatpush.msk.msrb.mxu2 %vm113_vm2, %v1498_v60  ;;  %v2472_v11 = vld [vmem:[%s3275_s4 + $0x18] sm:$0xf]  ;;  %v3315_v16 = vperm.slane %v2853_v35, 2 }
 0x1ed   :  { %2437 = vmatpush.msk.msrb.mxu0 %vm113_vm2, %v1496_v55  ;;  %2443 = vmatpush.msk.msrb.mxu3 %vm113_vm2, %v1499_v15  ;;  %v3316_v55 = vperm.slane %v2853_v35, 3  ;;  %v2481_v15 = vld [vmem:[%s3275_s4 + $0x1c] sm:$0xf] }
 0x1ee   :  { %2442 = vmatmul.msk.f32.vlgmr.msrb.gmra.mxu2 %vm109_vm3, %v2436_v9  ;;  %2444 = vmatmul.msk.f32.vlgmr.msrb.gmra.mxu3 %vm109_vm3, %v2436_v9 }
 0x1ef   :  { %2440 = vmatmul.msk.f32.vlgmr.msrb.gmra.mxu1 %vm109_vm3, %v2436_v9 }
 0x1f0   :  { %v1608_v0 = vpop.permute.xlu1 %1607  ;;  %2438 = vmatmul.msk.f32.vlgmr.msrb.gmra.mxu0 %vm109_vm3, %v2436_v9  ;;  %v1939_v54 = vpop.permute.xlu2 %1938 }
 0x1f1   :  { %v1606_v31 = vpop.permute.xlu0 %1605  ;;  %v1946_v3 = vsel %vm844_vm7, %v3093_v62, %v1939_v54 }
 0x1f2   :  { %v1609_v41 = vsel %vm460_vm5, %v1606_v31, %v1608_v0  ;;  %v1610_v8 = vsel %vm460_vm5, %v1604_v46, %v1606_v31 }
 0x1f3   :  { %v1615_v58 = vmul.f32 %v1610_v8, %v3303_v28  ;;  %v1616_v61 = vmul.f32 %v1609_v41, %v3304_v14  ;;  %v3317_v8 = vperm.slane %v2902_v12, 3 }
 0x1f5   :  { %2450 = vmatpush.msk.msra.mxu2 %vm113_vm2, %v1615_v58  ;;  %2452 = vmatpush.msk.msra.mxu3 %vm113_vm2, %v1616_v61  ;;  %v3318_v61 = vperm.slane %v2853_v35, 0 }
 0x1f6   :  { %2451 = vmatmul.msk.f32.vlgmr.msra.gmra.mxu2 %vm109_vm3, %v2445_v23  ;;  %2453 = vmatmul.msk.f32.vlgmr.msra.gmra.mxu3 %vm109_vm3, %v2445_v23 }
 0x1f7   :  { %2459 = vmatpush.msk.msrb.mxu2 %vm113_vm2, %v2964_v45  ;;  %2461 = vmatpush.msk.msrb.mxu3 %vm113_vm2, %v2962_v43 }
 0x1f8   :  { %v1820_v25 = vpop.permute.xlu1 %1819  ;;  %v2058_v30 = vpop.permute.xlu2 %2057 }
 0x1f9   :  { %v1830_v26 = vsel %vm704_vm6, %v1826_v10, %v1820_v25  ;;  %v1602_v33 = vpop.permute.xlu0 %1601 }
 0x1fa   :  { %v1834_v32 = vmul.f32 %v1830_v26, %v3305_v34  ;;  %v1611_v38 = vsel %vm460_vm5, %v1602_v33, %v1604_v46  ;;  %v1612_v39 = vsel %vm460_vm5, %v1608_v0, %v1602_v33  ;;  %v3311_v46 = vperm.slane %v2800_v4, 0  ;;  %v2490_v26 = vld [vmem:[%s3275_s4 + $0x20] sm:$0xf] }
 0x1fb   :  { %v1613_v45 = vmul.f32 %v1612_v39, %v3306_v42  ;;  %v1614_v43 = vmul.f32 %v1611_v38, %v3307_v47 }
 0x1fc   :  { %2470 = vmatpush.msk.msra.mxu3 %vm113_vm2, %v1834_v32  ;;  %v1948_v50 = vmul.f32 %v1946_v3, %v3311_v46  ;;  %v3320_v32 = vperm.slane %v2902_v12, 0 }
 0x1fd   :  { %2446 = vmatpush.msk.msra.mxu0 %vm113_vm2, %v1613_v45  ;;  %2448 = vmatpush.msk.msra.mxu1 %vm113_vm2, %v1614_v43  ;;  %v3321_v45 = vperm.slane %v2902_v12, 1  ;;  %v3322_v43 = vperm.slane %v2902_v12, 2 }
 0x1fe   :  { %2447 = vmatmul.msk.f32.vlgmr.msra.gmra.mxu0 %vm109_vm3, %v2445_v23  ;;  %2449 = vmatmul.msk.f32.vlgmr.msra.gmra.mxu1 %vm109_vm3, %v2445_v23 }
 0x1ff   :  { %2455 = vmatpush.msk.msrb.mxu0 %vm113_vm2, %v2952_v29  ;;  %2457 = vmatpush.msk.msrb.mxu1 %vm113_vm2, %v2954_v19 }
 0x200   :  { %2460 = vmatmul.msk.f32.vlgmr.msrb.gmra.mxu2 %vm109_vm3, %v2454_v52  ;;  %2462 = vmatmul.msk.f32.vlgmr.msrb.gmra.mxu3 %vm109_vm3, %v2454_v52  ;;  %v1822_v27 = vpop.permute.xlu1 %1821  ;;  %v2177_v9 = vpop.permute.xlu2 %2176 }
 0x201   :  { %v1829_v57 = vsel %vm704_vm6, %v1820_v25, %v1822_v27  ;;  %v1824_v59 = vpop.permute.xlu0 %1823 }
 0x202   :  { %v1831_v7 = vmul.f32 %v1829_v57, %v3308_v20  ;;  %v1827_v29 = vsel %vm704_vm6, %v1824_v59, %v1826_v10  ;;  %v1828_v19 = vsel %vm704_vm6, %v1822_v27, %v1824_v59  ;;  %v3319_v10 = vperm.slane %v2853_v35, 1 }
 0x203   :  { %v1832_v22 = vmul.f32 %v1828_v19, %v3309_v5  ;;  %v1833_v2 = vmul.f32 %v1827_v29, %v3310_v24 }
 0x204   :  { %2464 = vmatpush.msk.msra.mxu0 %vm113_vm2, %v1831_v7 }
 0x205   :  { %2466 = vmatpush.msk.msra.mxu1 %vm113_vm2, %v1832_v22  ;;  %2468 = vmatpush.msk.msra.mxu2 %vm113_vm2, %v1833_v2 }
 0x206   :  { %2456 = vmatmul.msk.f32.vlgmr.msrb.gmra.mxu0 %vm109_vm3, %v2454_v52  ;;  %2458 = vmatmul.msk.f32.vlgmr.msrb.gmra.mxu1 %vm109_vm3, %v2454_v52 }
 0x207   :  { %2473 = vmatpush.msk.msrb.mxu0 %vm113_vm2, %v1948_v50 }
 0x208   :  { %2469 = vmatmul.msk.f32.vlgmr.msra.gmra.mxu2 %vm109_vm3, %v2463_v51  ;;  %2471 = vmatmul.msk.f32.vlgmr.msra.gmra.mxu3 %vm109_vm3, %v2463_v51  ;;  %v1941_v56 = vpop.permute.xlu1 %1940 }
 0x209   :  { %v1945_v1 = vsel %vm844_vm7, %v1939_v54, %v1941_v56  ;;  %v1943_v13 = vpop.permute.xlu0 %1942 }
 0x20a   :  { %v1949_v63 = vmul.f32 %v1945_v1, %v3312_v17  ;;  %v1944_v40 = vsel %vm844_vm7, %v1941_v56, %v1943_v13  ;;  %v1947_v18 = vsel %vm844_vm7, %v1943_v13, %v3093_v62 }
 0x20b   :  { %v1950_v48 = vmul.f32 %v1944_v40, %v3313_v49  ;;  %v1951_v6 = vmul.f32 %v1947_v18, %v3314_v53 }
 0x20c   :  { %2475 = vmatpush.msk.msrb.mxu1 %vm113_vm2, %v1949_v63 }
 0x20d   :  { %2477 = vmatpush.msk.msrb.mxu2 %vm113_vm2, %v1950_v48  ;;  %2479 = vmatpush.msk.msrb.mxu3 %vm113_vm2, %v1951_v6 }
 0x20e   :  { %2465 = vmatmul.msk.f32.vlgmr.msra.gmra.mxu0 %vm109_vm3, %v2463_v51  ;;  %2467 = vmatmul.msk.f32.vlgmr.msra.gmra.mxu1 %vm109_vm3, %v2463_v51 }
 0x210   :  { %2478 = vmatmul.msk.f32.vlgmr.msrb.gmra.mxu2 %vm109_vm3, %v2472_v11  ;;  %2480 = vmatmul.msk.f32.vlgmr.msrb.gmra.mxu3 %vm109_vm3, %v2472_v11  ;;  %v2060_v4 = vpop.permute.xlu1 %2059 }
 0x211   :  { %v2061_v60 = vsel %vm984_vm8, %v2058_v30, %v2060_v4  ;;  %v2054_v37 = vpop.permute.xlu0 %2053 }
 0x212   :  { %v2067_v62 = vmul.f32 %v2061_v60, %v3315_v16  ;;  %v2064_v36 = vsel %vm984_vm8, %v2060_v4, %v2054_v37 }
 0x213   :  { %v2068_v21 = vmul.f32 %v2064_v36, %v3316_v55 }
 0x214   :  { %2486 = vmatpush.msk.msra.mxu2 %vm113_vm2, %v2067_v62 }
 0x215   :  { %2488 = vmatpush.msk.msra.mxu3 %vm113_vm2, %v2068_v21 }
 0x216   :  { %2474 = vmatmul.msk.f32.vlgmr.msrb.gmra.mxu0 %vm109_vm3, %v2472_v11  ;;  %2476 = vmatmul.msk.f32.vlgmr.msrb.gmra.mxu1 %vm109_vm3, %v2472_v11 }
 0x218   :  { %2487 = vmatmul.msk.f32.vlgmr.msra.gmra.mxu2 %vm109_vm3, %v2481_v15  ;;  %2489 = vmatmul.msk.f32.vlgmr.msra.gmra.mxu3 %vm109_vm3, %v2481_v15  ;;  %v2171_v0 = vpop.permute.xlu1 %2170 }
 0x219   :  { %v2181_v31 = vsel %vm1124_vm9, %v2177_v9, %v2171_v0  ;;  %v2056_v41 = vpop.permute.xlu0 %2055 }
 0x21a   :  { %v2185_v28 = vmul.f32 %v2181_v31, %v3317_v8  ;;  %v2062_v58 = vsel %vm984_vm8, %v2056_v41, %v2058_v30  ;;  %v2063_v14 = vsel %vm984_vm8, %v2054_v37, %v2056_v41 }
 0x21b   :  { %v2065_v23 = vmul.f32 %v2063_v14, %v3318_v61  ;;  %v2066_v25 = vmul.f32 %v2062_v58, %v3319_v10 }
 0x21c   :  { %2497 = vmatpush.msk.msrb.mxu3 %vm113_vm2, %v2185_v28 }
 0x21d   :  { %2482 = vmatpush.msk.msra.mxu0 %vm113_vm2, %v2065_v23  ;;  %2484 = vmatpush.msk.msra.mxu1 %vm113_vm2, %v2066_v25 }
 0x21e   :  { %2483 = vmatmul.msk.f32.vlgmr.msra.gmra.mxu0 %vm109_vm3, %v2481_v15  ;;  %2485 = vmatmul.msk.f32.vlgmr.msra.gmra.mxu1 %vm109_vm3, %v2481_v15 }
 0x220   :  { %2498 = vmatmul.msk.f32.vlgmr.msrb.gmra.mxu3 %vm109_vm3, %v2490_v26  ;;  %v2173_v33 = vpop.permute.xlu1 %2172 }
 0x221   :  { %v2180_v35 = vsel %vm1124_vm9, %v2171_v0, %v2173_v33  ;;  %v2175_v34 = vpop.permute.xlu0 %2174 }
 0x222   :  { %v2182_v38 = vmul.f32 %v2180_v35, %v3320_v32  ;;  %v2178_v39 = vsel %vm1124_vm9, %v2175_v34, %v2177_v9  ;;  %v2179_v42 = vsel %vm1124_vm9, %v2173_v33, %v2175_v34 }
 0x223   :  { %v2183_v47 = vmul.f32 %v2179_v42, %v3321_v45  ;;  %v2184_v52 = vmul.f32 %v2178_v39, %v3322_v43 }
 0x224   :  { %2491 = vmatpush.msk.msrb.mxu0 %vm113_vm2, %v2182_v38 }
 0x225   :  { %2493 = vmatpush.msk.msrb.mxu1 %vm113_vm2, %v2183_v47  ;;  %2495 = vmatpush.msk.msrb.mxu2 %vm113_vm2, %v2184_v52  ;;  %v2291_v47 = vpop.permute.xlu2 %2290  ;;  %v2303_v52 = vld.sshfl [vmem:[#allocation1 + $0x18] sm:$0xff pattern:$0x75316420] }
 0x226   :  { %2492 = vmatmul.msk.f32.vlgmr.msrb.gmra.mxu0 %vm109_vm3, %v2490_v26  ;;  %2494 = vmatmul.msk.f32.vlgmr.msrb.gmra.mxu1 %vm109_vm3, %v2490_v26 }
 0x227   :  { %2496 = vmatmul.msk.f32.vlgmr.msrb.gmra.mxu2 %vm109_vm3, %v2490_v26 }
 0x253   :  { %v1346_v44 = vpop.f32.mrf.mxu1 }
 0x25d   :  { %v1326_v54 = vpop.f32.mrf.mxu0 }
 0x261   :  { %v1366_v27 = vpop.f32.mrf.mxu2  ;;  %v1386_v57 = vpop.f32.mrf.mxu3 }
 0x264   :  { %v1441_v59 = vpop.f32.mrf.mxu1 }
 0x265   :  { %v1421_v3 = vpop.f32.mrf.mxu0  ;;  %v1442_v11 = vadd.f32 %v1441_v59, %v1346_v44  ;;  %v2301_v59 = vld.sshfl [vmem:[#allocation1 + $0x8] sm:$0xff pattern:$0x75316420] }
 0x266   :  { %v1422_v53 = vadd.f32 %v1421_v3, %v1326_v54 }
 0x269   :  { %v1461_v12 = vpop.f32.mrf.mxu2  ;;  %v1481_v20 = vpop.f32.mrf.mxu3 }
 0x26a   :  { %v1482_v6 = vadd.f32 %v1481_v20, %v1386_v57  ;;  %v1462_v0 = vadd.f32 %v1461_v12, %v1366_v27  ;;  %v2300_v57 = vld.sshfl [vmem:[#allocation1] sm:$0xff pattern:$0x75316420] }
 0x26c   :  { %v1554_v19 = vpop.f32.mrf.mxu1 }
 0x26d   :  { %v1534_v5 = vpop.f32.mrf.mxu0  ;;  %v1598_v60 = vadd.f32 %v1554_v19, %v1442_v11 }
 0x26e   :  { %v1597_v37 = vadd.f32 %v1534_v5, %v1422_v53 }
 0x271   :  { %v1574_v7 = vpop.f32.mrf.mxu2  ;;  %v1594_v29 = vpop.f32.mrf.mxu3 }
 0x272   :  { %v1600_v30 = vadd.f32 %v1594_v29, %v1482_v6  ;;  %v1599_v28 = vadd.f32 %v1574_v7, %v1462_v0 }
 0x279   :  { %v1691_v22 = vpop.f32.mrf.mxu2  ;;  %v1711_v24 = vpop.f32.mrf.mxu3 }
 0x27a   :  { %v1717_v16 = vadd.f32 %v1711_v24, %v1600_v30  ;;  %v1716_v23 = vadd.f32 %v1691_v22, %v1599_v28 }
 0x27b   :  { %v1651_v2 = vpop.f32.mrf.mxu0  ;;  %v1671_v46 = vpop.f32.mrf.mxu1 }
 0x27c   :  { %v1714_v62 = vadd.f32 %v1651_v2, %v1597_v37  ;;  %v1715_v36 = vadd.f32 %v1671_v46, %v1598_v60  ;;  %v2302_v46 = vld.sshfl [vmem:[#allocation1 + $0x10] sm:$0xff pattern:$0x75316420] }
 0x283   :  { %v1792_v50 = vpop.f32.mrf.mxu2  ;;  %v1812_v51 = vpop.f32.mrf.mxu3 }
 0x284   :  { %v1752_v56 = vpop.f32.mrf.mxu0  ;;  %v1772_v1 = vpop.f32.mrf.mxu1  ;;  %v1818_v21 = vadd.f32 %v1812_v51, %v1717_v16  ;;  %v1817_v35 = vadd.f32 %v1792_v50, %v1716_v23 }
 0x285   :  { %v1815_v31 = vadd.f32 %v1752_v56, %v1714_v62  ;;  %v1816_v41 = vadd.f32 %v1772_v1, %v1715_v36 }
 0x28b   :  { %v1929_v13 = vpop.f32.mrf.mxu3  ;;  %v1909_v40 = vpop.f32.mrf.mxu2 }
 0x28c   :  { %v1869_v17 = vpop.f32.mrf.mxu0  ;;  %v1889_v63 = vpop.f32.mrf.mxu1  ;;  %v1935_v8 = vadd.f32 %v1929_v13, %v1818_v21  ;;  %v1934_v43 = vadd.f32 %v1909_v40, %v1817_v35 }
 0x28d   :  { %v1932_v58 = vadd.f32 %v1869_v17, %v1815_v31  ;;  %v1933_v14 = vadd.f32 %v1889_v63, %v1816_v41 }
 0x293   :  { %v2046_v18 = vpop.f32.mrf.mxu3  ;;  %v2026_v4 = vpop.f32.mrf.mxu2 }
 0x294   :  { %v1986_v49 = vpop.f32.mrf.mxu0  ;;  %v2006_v48 = vpop.f32.mrf.mxu1  ;;  %v2052_v61 = vadd.f32 %v2046_v18, %v1935_v8  ;;  %v2051_v3 = vadd.f32 %v2026_v4, %v1934_v43 }
 0x295   :  { %v2049_v10 = vadd.f32 %v1986_v49, %v1932_v58  ;;  %v2050_v25 = vadd.f32 %v2006_v48, %v1933_v14 }
 0x29b   :  { %v2163_v55 = vpop.f32.mrf.mxu3  ;;  %v2143_v26 = vpop.f32.mrf.mxu2 }
 0x29c   :  { %v2103_v15 = vpop.f32.mrf.mxu0  ;;  %v2123_v9 = vpop.f32.mrf.mxu1  ;;  %v2169_v33 = vadd.f32 %v2163_v55, %v2052_v61  ;;  %v2168_v7 = vadd.f32 %v2143_v26, %v2051_v3 }
 0x29d   :  { %v2166_v34 = vadd.f32 %v2103_v15, %v2049_v10  ;;  %v2167_v32 = vadd.f32 %v2123_v9, %v2050_v25 }
 0x2a3   :  { %v2280_v38 = vpop.f32.mrf.mxu3 }
 0x2a4   :  { %v2286_v39 = vadd.f32 %v2280_v38, %v2169_v33  ;;  %v2220_v42 = vpop.f32.mrf.mxu0  ;;  %v2240_v45 = vpop.f32.mrf.mxu1 }
 0x2a5   :  { %v2283_v44 = vadd.f32 %v2220_v42, %v2166_v34  ;;  %v2284_v54 = vadd.f32 %v2240_v45, %v2167_v32 }
 0x2a6   :  { %v2296_v27 = vadd.f32 %v2291_v47, %v2286_v39 }
 0x2a7   :  { %v2293_v12 = vadd.f32 %v2291_v47, %v2283_v44  ;;  %v2294_v20 = vadd.f32 %v2291_v47, %v2284_v54 }
 0x2a8   :  { %v2311_v29 = vadd.f32 %v2303_v52, %v2296_v27 }
 0x2a9   :  { %v2308_v19 = vadd.f32 %v2300_v57, %v2293_v12  ;;  %v2309_v5 = vadd.f32 %v2301_v59, %v2294_v20 }
 0x2aa   :  { %v2260_v22 = vpop.f32.mrf.mxu2  ;;  %v2315_v50 = vmax.f32 %v2311_v29, 0.0 }
 0x2ab   :  { %v2313_v24 = vmax.f32 %v2309_v5, 0.0  ;;  %v2285_v2 = vadd.f32 %v2260_v22, %v2168_v7  ;;  %v2312_v51 = vmax.f32 %v2308_v19, 0.0 }
 0x2ac   :  { %v2321_v63 = vrot.slane %v2315_v50, 4 }
 0x2ad   :  { %v2320_v56 = vrot.slane %v2313_v24, 4  ;;  %v2295_v1 = vadd.f32 %v2291_v47, %v2285_v2 }
 0x2af   :  { %v2322_v13 = vsel %vm113_vm2, %v2312_v51, %v2320_v56  ;;  %v2310_v17 = vadd.f32 %v2302_v46, %v2295_v1 }
 0x2b0   :  { %2326 = vst [vmem:[%s3276_s6] sm:$0xff] %v2322_v13 }
 0x2b1   :  { %v2314_v40 = vmax.f32 %v2310_v17, 0.0 }
 0x2b3   :  { %v2323_v18 = vsel %vm113_vm2, %v2314_v40, %v2321_v63 }
 0x2b4   :  { %2327 = vst [vmem:[%s3276_s6 + $0x8] sm:$0xff] %v2323_v18 }

</bundles_post_ra>
